<compile_context>
chip_gen: v6e
topology: v6e:2x2x1
jax: 0.10.0
libtpu: 0.0.40
codegen_flags: <defaults>
</compile_context>

<pallas_src>
import functools

import jax
import jax.numpy as jnp
import numpy as np
from jax.experimental import pallas as pl
from jax.experimental.pallas import tpu as pltpu

LN_EPS = 1e-5  # torch.nn.LayerNorm default


# ----------------------------------------------------------------------------
# Fused decoder-block kernel (single invocation, whole (N*L, E) slab)
# ----------------------------------------------------------------------------
def _decoder_block_kernel(
    x_ref, v_ref, k_ref,
    wq1_ref, wk1_ref, wv1_ref, wo1_ref,
    wq2_ref, wk2_ref, wv2_ref, wo2_ref,
    w1_ref, w2_ref,
    vecs_ref, b1_ref,
    o_ref,
    concat_scr,                       # VMEM scratch (M, E) f32: per-head output assembly
    *, batch, seq_len, heads):
    M, E = x_ref.shape
    D = E // heads
    L = seq_len

    vecs = vecs_ref[...]              # (9, E) f32: biases + LayerNorm params, packed
    bo1, ln_g, ln_b = vecs[0:1], vecs[1:2], vecs[2:3]
    bo2, ln1_g, ln1_b = vecs[3:4], vecs[4:5], vecs[5:6]
    ff_b2, ln2_g, ln2_b = vecs[6:7], vecs[7:8], vecs[8:9]

    def layernorm(t, g, b):           # f32 vector math (v5e-safe)
        mu = jnp.mean(t, axis=-1, keepdims=True)
        var = jnp.mean((t - mu) ** 2, axis=-1, keepdims=True)
        return (t - mu) * jax.lax.rsqrt(var + LN_EPS) * g + b

    def mha(q_slab, k_slab, v_slab, wq_ref, wk_ref, wv_ref, wo_ref, bo):
        # Per-token projections: one lane-dense (M,E)@(E,E) bf16 matmul each
        # (block-diagonal per-head weights, f32 accumulation).  The 1/sqrt(E)
        # softmax scale is already folded into wq on the host.
        qp = jnp.dot(q_slab.astype(jnp.bfloat16), wq_ref[...],
                     preferred_element_type=jnp.float32)
        kp = jnp.dot(k_slab.astype(jnp.bfloat16), wk_ref[...],
                     preferred_element_type=jnp.float32)
        vp = jnp.dot(v_slab.astype(jnp.bfloat16), wv_ref[...],
                     preferred_element_type=jnp.float32)

        # Attention core per (batch, head) on (L, D) slices: exact FLOPs (no masked
        # H x zero-work) and no repeated transposes.  Head outputs land in their own
        # columns of the scratch, rebuilding the concat without any concatenate op.
        for n in range(batch):                       # static unroll (small N)
            r = n * L
            for h in range(heads):                   # static unroll (small H)
                c = h * D
                qh = qp[r:r + L, c:c + D].astype(jnp.bfloat16)
                kh = kp[r:r + L, c:c + D].astype(jnp.bfloat16)
                vh = vp[r:r + L, c:c + D].astype(jnp.bfloat16)
                s = jax.lax.dot_general(qh, kh, (((1,), (1,)), ((), ())),
                                        preferred_element_type=jnp.float32)  # (L, L)
                s = s - jnp.max(s, axis=-1, keepdims=True)                   # f32 softmax
                p = jnp.exp(s)
                p = p * pl.reciprocal(jnp.sum(p, axis=-1, keepdims=True), approx=True)
                concat_scr[r:r + L, c:c + D] = jnp.dot(
                    p.astype(jnp.bfloat16), vh, preferred_element_type=jnp.float32)

        # Single dense output projection on the full slab (lane-dense bf16 matmul).
        concat = concat_scr[...].astype(jnp.bfloat16)
        return jnp.dot(concat, wo_ref[...], preferred_element_type=jnp.float32) + bo

    x = x_ref[...].astype(jnp.float32)

    # attention = self.attention(x, x, x, target_mask)
    attn1 = mha(x, x, x, wq1_ref, wk1_ref, wv1_ref, wo1_ref, bo1)
    # query = dropout(layer_norm(attention + x))   (dropout = identity)
    query = layernorm(attn1 + x, ln_g, ln_b)

    # TransformerBlock: attention(value, key, query, source_mask)
    v = v_ref[...].astype(jnp.float32)
    k = k_ref[...].astype(jnp.float32)
    attn2 = mha(query, k, v, wq2_ref, wk2_ref, wv2_ref, wo2_ref, bo2)
    x2 = layernorm(attn2 + query, ln1_g, ln1_b)

    # feed_forward: relu(x2 @ W1.T + b1) @ W2.T + b2   (pre-transposed bf16 weights)
    h1 = jnp.dot(x2.astype(jnp.bfloat16), w1_ref[...],
                 preferred_element_type=jnp.float32) + b1_ref[...]
    h1 = jnp.maximum(h1, 0.0)
    ff = jnp.dot(h1.astype(jnp.bfloat16), w2_ref[...],
                 preferred_element_type=jnp.float32) + ff_b2

    o_ref[...] = layernorm(ff + x2, ln2_g, ln2_b).astype(o_ref.dtype)


# ----------------------------------------------------------------------------
# Host-side one-time weight preparation (cache & reuse across forward calls)
# ----------------------------------------------------------------------------
def _block_diag_T(w, heads):
    """(D, D) per-head nn.Linear weight -> (E, E) block-diag of w.T, so x @ result
    applies w.T independently to each head's D-wide slice of the last dim."""
    return jnp.kron(jnp.eye(heads, dtype=w.dtype), w.T)


def prepare_decoder_weights(params, heads):
    E = params["attn1"]["wo"].shape[0]
    scale = 1.0 / (E ** 0.5)   # reference scales by sqrt(embeddings_size), not sqrt(head_dim)

    def attn_weights(a):
        return ((_block_diag_T(a["wq"], heads) * scale).astype(jnp.bfloat16),
                _block_diag_T(a["wk"], heads).astype(jnp.bfloat16),
                _block_diag_T(a["wv"], heads).astype(jnp.bfloat16),
                a["wo"].T.astype(jnp.bfloat16))

    wq1, wk1, wv1, wo1 = attn_weights(params["attn1"])
    wq2, wk2, wv2, wo2 = attn_weights(params["attn2"])
    vecs = jnp.stack([params["attn1"]["bo"], params["ln_g"], params["ln_b"],
                      params["attn2"]["bo"], params["tb_ln1_g"], params["tb_ln1_b"],
                      params["ff_b2"], params["tb_ln2_g"], params["tb_ln2_b"]],
                     axis=0).astype(jnp.float32)                    # (9, E)
    return {
        "wq1": wq1, "wk1": wk1, "wv1": wv1, "wo1": wo1,
        "wq2": wq2, "wk2": wk2, "wv2": wv2, "wo2": wo2,
        "w1t": params["ff_w1"].T.astype(jnp.bfloat16),              # (E, F)
        "w2t": params["ff_w2"].T.astype(jnp.bfloat16),              # (F, E)
        "vecs": vecs,
        "b1": params["ff_b1"].reshape(1, -1).astype(jnp.float32),   # (1, F)
    }


def decoder_block(x, value, key_t, prepared, heads):
    """DecoderBlock.forward as one fused Pallas kernel (dropout = identity, masks = None)."""
    N, L, E = x.shape
    M = N * L
    w = prepared
    out = pl.pallas_call(
        functools.partial(_decoder_block_kernel, batch=N, seq_len=L, heads=heads),
        out_shape=jax.ShapeDtypeStruct((M, E), x.dtype),
        scratch_shapes=[pltpu.VMEM((M, E), jnp.float32)],
    )(x.reshape(M, E), value.reshape(M, E), key_t.reshape(M, E),
      w["wq1"], w["wk1"], w["wv1"], w["wo1"],
      w["wq2"], w["wk2"], w["wv2"], w["wo2"],
      w["w1t"], w["w2t"], w["vecs"], w["b1"])
    return out.reshape(N, L, E)


# ----------------------------------------------------------------------------
# Pure-JAX f32 reference (for numerical verification)
# ----------------------------------------------------------------------------
def _ref_attention(values, keys, query, p, E, H):
    N, Lq, _ = query.shape
    Lk = keys.shape[1]
    D = E // H
    v = values.reshape(N, Lk, H, D) @ p["wv"].T
    k = keys.reshape(N, Lk, H, D) @ p["wk"].T
    q = query.reshape(N, Lq, H, D) @ p["wq"].T
    scores = jnp.einsum("nqhd,nkhd->nhqk", q, k)
    att = jax.nn.softmax(scores / (E ** 0.5), axis=3)
    out = jnp.einsum("nhql,nlhd->nqhd", att, v).reshape(N, Lq, E)
    return out @ p["wo"].T + p["bo"]


def _ref_ln(x, g, b):
    m = x.mean(-1, keepdims=True)
    v = ((x - m) ** 2).mean(-1, keepdims=True)
    return (x - m) / jnp.sqrt(v + LN_EPS) * g + b


def _ref_decoder_block(x, value, key_t, params, E, H):
    a1 = _ref_attention(x, x, x, params["attn1"], E, H)
    query = _ref_ln(a1 + x, params["ln_g"], params["ln_b"])
    a2 = _ref_attention(value, key_t, query, params["attn2"], E, H)
    x2 = _ref_ln(a2 + query, params["tb_ln1_g"], params["tb_ln1_b"])
    h = jnp.maximum(x2 @ params["ff_w1"].T + params["ff_b1"], 0.0)
    ff = h @ params["ff_w2"].T + params["ff_b2"]
    return _ref_ln(ff + x2, params["tb_ln2_g"], params["tb_ln2_b"])


# ----------------------------------------------------------------------------
# Parameter construction (torch.nn.Linear-style init)
# ----------------------------------------------------------------------------
def _lin_w(k, out_f, in_f):
    bound = 1.0 / (in_f ** 0.5)
    return jax.random.uniform(k, (out_f, in_f), jnp.float32, -bound, bound)


def make_params(rng, E, H, forward_expansion):
    D = E // H
    F = forward_expansion * E
    ks = list(jax.random.split(rng, 16))

    def attn_params(k0, k1, k2, k3, k4):
        return {
            "wv": _lin_w(k0, D, D),
            "wk": _lin_w(k1, D, D),
            "wq": _lin_w(k2, D, D),
            "wo": _lin_w(k3, E, E),
            "bo": jax.random.uniform(k4, (E,), jnp.float32, -1.0 / E ** 0.5, 1.0 / E ** 0.5),
        }

    return {
        "attn1": attn_params(*ks[0:5]),
        "attn2": attn_params(*ks[5:10]),
        "ln_g": jnp.ones((E,), jnp.float32),
        "ln_b": jnp.zeros((E,), jnp.float32),
        "tb_ln1_g": jnp.ones((E,), jnp.float32),
        "tb_ln1_b": jnp.zeros((E,), jnp.float32),
        "tb_ln2_g": jnp.ones((E,), jnp.float32),
        "tb_ln2_b": jnp.zeros((E,), jnp.float32),
        "ff_w1": _lin_w(ks[10], F, E),
        "ff_b1": jax.random.uniform(ks[11], (F,), jnp.float32, -1.0 / E ** 0.5, 1.0 / E ** 0.5),
        "ff_w2": _lin_w(ks[12], E, F),
        "ff_b2": jax.random.uniform(ks[13], (E,), jnp.float32, -1.0 / F ** 0.5, 1.0 / F ** 0.5),
    }


if __name__ == "__main__":
    E, H, FWD_EXP = 32, 4, 4
    N, L = 2, 8

    root = jax.random.PRNGKey(0)
    k_params, k_x, k_v, k_k = jax.random.split(root, 4)
    params = make_params(k_params, E, H, FWD_EXP)
    prepared = prepare_decoder_weights(params, H)     # one-time host prep, reused per call

    x = jax.random.normal(k_x, (N, L, E), jnp.float32)
    value = jax.random.normal(k_v, (N, L, E), jnp.float32)
    key_t = jax.random.normal(k_k, (N, L, E), jnp.float32)

    out = decoder_block(x, value, key_t, prepared, H)
    out = jax.block_until_ready(out)

    ref = _ref_decoder_block(x, value, key_t, params, E, H)
    # Tolerance covers bf16 MXU operands (f32 accumulation) and the approximate
    # (EUP) reciprocal in the softmax; reference is pure f32.
    np.testing.assert_allclose(np.asarray(out), np.asarray(ref), rtol=3e-2, atol=3e-2)

    print("KERNEL_OK")
</pallas_src>

<mosaic_0001>
module attributes {stable_mosaic.version = 11 : i64} {
  func.func @_decoder_block_kernel(%arg0: memref<16x32xf32, #tpu.memory_space<vmem>>, %arg1: memref<16x32xf32, #tpu.memory_space<vmem>>, %arg2: memref<16x32xf32, #tpu.memory_space<vmem>>, %arg3: memref<32x32xbf16, #tpu.memory_space<vmem>>, %arg4: memref<32x32xbf16, #tpu.memory_space<vmem>>, %arg5: memref<32x32xbf16, #tpu.memory_space<vmem>>, %arg6: memref<32x32xbf16, #tpu.memory_space<vmem>>, %arg7: memref<32x32xbf16, #tpu.memory_space<vmem>>, %arg8: memref<32x32xbf16, #tpu.memory_space<vmem>>, %arg9: memref<32x32xbf16, #tpu.memory_space<vmem>>, %arg10: memref<32x32xbf16, #tpu.memory_space<vmem>>, %arg11: memref<32x128xbf16, #tpu.memory_space<vmem>>, %arg12: memref<128x32xbf16, #tpu.memory_space<vmem>>, %arg13: memref<9x32xf32, #tpu.memory_space<vmem>>, %arg14: memref<1x128xf32, #tpu.memory_space<vmem>>, %arg15: memref<16x32xf32, #tpu.memory_space<vmem>>, %arg16: memref<16x32xf32, #tpu.memory_space<vmem>>) attributes {dimension_semantics = [], scalar_prefetch = 0 : i64, scratch_operands = 1 : i64, tpu.core_type = #tpu.core_type<tc>} {
    %c0 = arith.constant 0 : index
    %c0_0 = arith.constant 0 : index
    %0 = vector.load %arg13[%c0, %c0_0] : memref<9x32xf32, #tpu.memory_space<vmem>>, vector<9x32xf32>
    %1 = vector.extract_strided_slice %0 {offsets = [0, 0], sizes = [1, 32], strides = [1, 1]} : vector<9x32xf32> to vector<1x32xf32>
    %2 = vector.extract_strided_slice %0 {offsets = [1, 0], sizes = [1, 32], strides = [1, 1]} : vector<9x32xf32> to vector<1x32xf32>
    %3 = vector.extract_strided_slice %0 {offsets = [2, 0], sizes = [1, 32], strides = [1, 1]} : vector<9x32xf32> to vector<1x32xf32>
    %4 = vector.extract_strided_slice %0 {offsets = [3, 0], sizes = [1, 32], strides = [1, 1]} : vector<9x32xf32> to vector<1x32xf32>
    %5 = vector.extract_strided_slice %0 {offsets = [4, 0], sizes = [1, 32], strides = [1, 1]} : vector<9x32xf32> to vector<1x32xf32>
    %6 = vector.extract_strided_slice %0 {offsets = [5, 0], sizes = [1, 32], strides = [1, 1]} : vector<9x32xf32> to vector<1x32xf32>
    %7 = vector.extract_strided_slice %0 {offsets = [6, 0], sizes = [1, 32], strides = [1, 1]} : vector<9x32xf32> to vector<1x32xf32>
    %8 = vector.extract_strided_slice %0 {offsets = [7, 0], sizes = [1, 32], strides = [1, 1]} : vector<9x32xf32> to vector<1x32xf32>
    %9 = vector.extract_strided_slice %0 {offsets = [8, 0], sizes = [1, 32], strides = [1, 1]} : vector<9x32xf32> to vector<1x32xf32>
    %c0_1 = arith.constant 0 : index
    %c0_2 = arith.constant 0 : index
    %10 = vector.load %arg0[%c0_1, %c0_2] : memref<16x32xf32, #tpu.memory_space<vmem>>, vector<16x32xf32>
    %11 = arith.truncf %10 : vector<16x32xf32> to vector<16x32xbf16>
    %c0_3 = arith.constant 0 : index
    %c0_4 = arith.constant 0 : index
    %12 = vector.load %arg3[%c0_3, %c0_4] : memref<32x32xbf16, #tpu.memory_space<vmem>>, vector<32x32xbf16>
    %cst = arith.constant dense<0.000000e+00> : vector<16x32xf32>
    %13 = tpu.matmul %11, %12, %cst {dimension_numbers = #tpu.dot_dimension_numbers<[1], [0], [0], [1], [0, 0, 1, 1], [], []>} : vector<16x32xbf16>, vector<32x32xbf16>, vector<16x32xf32> -> vector<16x32xf32>
    %14 = arith.truncf %10 : vector<16x32xf32> to vector<16x32xbf16>
    %c0_5 = arith.constant 0 : index
    %c0_6 = arith.constant 0 : index
    %15 = vector.load %arg4[%c0_5, %c0_6] : memref<32x32xbf16, #tpu.memory_space<vmem>>, vector<32x32xbf16>
    %cst_7 = arith.constant dense<0.000000e+00> : vector<16x32xf32>
    %16 = tpu.matmul %14, %15, %cst_7 {dimension_numbers = #tpu.dot_dimension_numbers<[1], [0], [0], [1], [0, 0, 1, 1], [], []>} : vector<16x32xbf16>, vector<32x32xbf16>, vector<16x32xf32> -> vector<16x32xf32>
    %17 = arith.truncf %10 : vector<16x32xf32> to vector<16x32xbf16>
    %c0_8 = arith.constant 0 : index
    %c0_9 = arith.constant 0 : index
    %18 = vector.load %arg5[%c0_8, %c0_9] : memref<32x32xbf16, #tpu.memory_space<vmem>>, vector<32x32xbf16>
    %cst_10 = arith.constant dense<0.000000e+00> : vector<16x32xf32>
    %19 = tpu.matmul %17, %18, %cst_10 {dimension_numbers = #tpu.dot_dimension_numbers<[1], [0], [0], [1], [0, 0, 1, 1], [], []>} : vector<16x32xbf16>, vector<32x32xbf16>, vector<16x32xf32> -> vector<16x32xf32>
    %20 = vector.extract_strided_slice %13 {offsets = [0, 0], sizes = [8, 8], strides = [1, 1]} : vector<16x32xf32> to vector<8x8xf32>
    %21 = arith.truncf %20 : vector<8x8xf32> to vector<8x8xbf16>
    %22 = vector.extract_strided_slice %16 {offsets = [0, 0], sizes = [8, 8], strides = [1, 1]} : vector<16x32xf32> to vector<8x8xf32>
    %23 = arith.truncf %22 : vector<8x8xf32> to vector<8x8xbf16>
    %24 = vector.extract_strided_slice %19 {offsets = [0, 0], sizes = [8, 8], strides = [1, 1]} : vector<16x32xf32> to vector<8x8xf32>
    %25 = arith.truncf %24 : vector<8x8xf32> to vector<8x8xbf16>
    %cst_11 = arith.constant dense<0.000000e+00> : vector<8x8xf32>
    %26 = tpu.matmul %21, %23, %cst_11 {dimension_numbers = #tpu.dot_dimension_numbers<[1], [1], [0], [0], [0, 0, 1, 0], [], []>} : vector<8x8xbf16>, vector<8x8xbf16>, vector<8x8xf32> -> vector<8x8xf32>
    %cst_12 = arith.constant dense<0xFF800000> : vector<8xf32>
    %27 = vector.multi_reduction <maximumf>, %26, %cst_12 [1] : vector<8x8xf32> to vector<8xf32>
    %28 = vector.shape_cast %27 : vector<8xf32> to vector<8x1xf32>
    %29 = vector.broadcast %28 : vector<8x1xf32> to vector<8x8xf32>
    %30 = arith.subf %26, %29 : vector<8x8xf32>
    %31 = math.exp %30 : vector<8x8xf32>
    %cst_13 = arith.constant dense<0.000000e+00> : vector<8xf32>
    %32 = vector.multi_reduction <add>, %31, %cst_13 [1] : vector<8x8xf32> to vector<8xf32>
    %33 = vector.shape_cast %32 : vector<8xf32> to vector<8x1xf32>
    %34 = tpu.reciprocal %33 {approx = true} : vector<8x1xf32> -> vector<8x1xf32>
    %35 = vector.broadcast %34 : vector<8x1xf32> to vector<8x8xf32>
    %36 = arith.mulf %31, %35 : vector<8x8xf32>
    %37 = arith.truncf %36 : vector<8x8xf32> to vector<8x8xbf16>
    %cst_14 = arith.constant dense<0.000000e+00> : vector<8x8xf32>
    %38 = tpu.matmul %37, %25, %cst_14 {dimension_numbers = #tpu.dot_dimension_numbers<[1], [0], [0], [1], [0, 0, 1, 1], [], []>} : vector<8x8xbf16>, vector<8x8xbf16>, vector<8x8xf32> -> vector<8x8xf32>
    %c0_15 = arith.constant 0 : index
    %c0_16 = arith.constant 0 : index
    %39 = vector.load %arg16[%c0_15, %c0_16] : memref<16x32xf32, #tpu.memory_space<vmem>>, vector<8x8xf32>
    tpu.vector_store %arg16[%c0_15, %c0_16], %38 {strides = array<i32>} : memref<16x32xf32, #tpu.memory_space<vmem>>, vector<8x8xf32>,
    %40 = vector.extract_strided_slice %13 {offsets = [0, 8], sizes = [8, 8], strides = [1, 1]} : vector<16x32xf32> to vector<8x8xf32>
    %41 = arith.truncf %40 : vector<8x8xf32> to vector<8x8xbf16>
    %42 = vector.extract_strided_slice %16 {offsets = [0, 8], sizes = [8, 8], strides = [1, 1]} : vector<16x32xf32> to vector<8x8xf32>
    %43 = arith.truncf %42 : vector<8x8xf32> to vector<8x8xbf16>
    %44 = vector.extract_strided_slice %19 {offsets = [0, 8], sizes = [8, 8], strides = [1, 1]} : vector<16x32xf32> to vector<8x8xf32>
    %45 = arith.truncf %44 : vector<8x8xf32> to vector<8x8xbf16>
    %cst_17 = arith.constant dense<0.000000e+00> : vector<8x8xf32>
    %46 = tpu.matmul %41, %43, %cst_17 {dimension_numbers = #tpu.dot_dimension_numbers<[1], [1], [0], [0], [0, 0, 1, 0], [], []>} : vector<8x8xbf16>, vector<8x8xbf16>, vector<8x8xf32> -> vector<8x8xf32>
    %cst_18 = arith.constant dense<0xFF800000> : vector<8xf32>
    %47 = vector.multi_reduction <maximumf>, %46, %cst_18 [1] : vector<8x8xf32> to vector<8xf32>
    %48 = vector.shape_cast %47 : vector<8xf32> to vector<8x1xf32>
    %49 = vector.broadcast %48 : vector<8x1xf32> to vector<8x8xf32>
    %50 = arith.subf %46, %49 : vector<8x8xf32>
    %51 = math.exp %50 : vector<8x8xf32>
    %cst_19 = arith.constant dense<0.000000e+00> : vector<8xf32>
    %52 = vector.multi_reduction <add>, %51, %cst_19 [1] : vector<8x8xf32> to vector<8xf32>
    %53 = vector.shape_cast %52 : vector<8xf32> to vector<8x1xf32>
    %54 = tpu.reciprocal %53 {approx = true} : vector<8x1xf32> -> vector<8x1xf32>
    %55 = vector.broadcast %54 : vector<8x1xf32> to vector<8x8xf32>
    %56 = arith.mulf %51, %55 : vector<8x8xf32>
    %57 = arith.truncf %56 : vector<8x8xf32> to vector<8x8xbf16>
    %cst_20 = arith.constant dense<0.000000e+00> : vector<8x8xf32>
    %58 = tpu.matmul %57, %45, %cst_20 {dimension_numbers = #tpu.dot_dimension_numbers<[1], [0], [0], [1], [0, 0, 1, 1], [], []>} : vector<8x8xbf16>, vector<8x8xbf16>, vector<8x8xf32> -> vector<8x8xf32>
    %c0_21 = arith.constant 0 : index
    %c8 = arith.constant 8 : index
    %59 = vector.load %arg16[%c0_21, %c8] : memref<16x32xf32, #tpu.memory_space<vmem>>, vector<8x8xf32>
    tpu.vector_store %arg16[%c0_21, %c8], %58 {strides = array<i32>} : memref<16x32xf32, #tpu.memory_space<vmem>>, vector<8x8xf32>,
    %60 = vector.extract_strided_slice %13 {offsets = [0, 16], sizes = [8, 8], strides = [1, 1]} : vector<16x32xf32> to vector<8x8xf32>
    %61 = arith.truncf %60 : vector<8x8xf32> to vector<8x8xbf16>
    %62 = vector.extract_strided_slice %16 {offsets = [0, 16], sizes = [8, 8], strides = [1, 1]} : vector<16x32xf32> to vector<8x8xf32>
    %63 = arith.truncf %62 : vector<8x8xf32> to vector<8x8xbf16>
    %64 = vector.extract_strided_slice %19 {offsets = [0, 16], sizes = [8, 8], strides = [1, 1]} : vector<16x32xf32> to vector<8x8xf32>
    %65 = arith.truncf %64 : vector<8x8xf32> to vector<8x8xbf16>
    %cst_22 = arith.constant dense<0.000000e+00> : vector<8x8xf32>
    %66 = tpu.matmul %61, %63, %cst_22 {dimension_numbers = #tpu.dot_dimension_numbers<[1], [1], [0], [0], [0, 0, 1, 0], [], []>} : vector<8x8xbf16>, vector<8x8xbf16>, vector<8x8xf32> -> vector<8x8xf32>
    %cst_23 = arith.constant dense<0xFF800000> : vector<8xf32>
    %67 = vector.multi_reduction <maximumf>, %66, %cst_23 [1] : vector<8x8xf32> to vector<8xf32>
    %68 = vector.shape_cast %67 : vector<8xf32> to vector<8x1xf32>
    %69 = vector.broadcast %68 : vector<8x1xf32> to vector<8x8xf32>
    %70 = arith.subf %66, %69 : vector<8x8xf32>
    %71 = math.exp %70 : vector<8x8xf32>
    %cst_24 = arith.constant dense<0.000000e+00> : vector<8xf32>
    %72 = vector.multi_reduction <add>, %71, %cst_24 [1] : vector<8x8xf32> to vector<8xf32>
    %73 = vector.shape_cast %72 : vector<8xf32> to vector<8x1xf32>
    %74 = tpu.reciprocal %73 {approx = true} : vector<8x1xf32> -> vector<8x1xf32>
    %75 = vector.broadcast %74 : vector<8x1xf32> to vector<8x8xf32>
    %76 = arith.mulf %71, %75 : vector<8x8xf32>
    %77 = arith.truncf %76 : vector<8x8xf32> to vector<8x8xbf16>
    %cst_25 = arith.constant dense<0.000000e+00> : vector<8x8xf32>
    %78 = tpu.matmul %77, %65, %cst_25 {dimension_numbers = #tpu.dot_dimension_numbers<[1], [0], [0], [1], [0, 0, 1, 1], [], []>} : vector<8x8xbf16>, vector<8x8xbf16>, vector<8x8xf32> -> vector<8x8xf32>
    %c0_26 = arith.constant 0 : index
    %c16 = arith.constant 16 : index
    %79 = vector.load %arg16[%c0_26, %c16] : memref<16x32xf32, #tpu.memory_space<vmem>>, vector<8x8xf32>
    tpu.vector_store %arg16[%c0_26, %c16], %78 {strides = array<i32>} : memref<16x32xf32, #tpu.memory_space<vmem>>, vector<8x8xf32>,
    %80 = vector.extract_strided_slice %13 {offsets = [0, 24], sizes = [8, 8], strides = [1, 1]} : vector<16x32xf32> to vector<8x8xf32>
    %81 = arith.truncf %80 : vector<8x8xf32> to vector<8x8xbf16>
    %82 = vector.extract_strided_slice %16 {offsets = [0, 24], sizes = [8, 8], strides = [1, 1]} : vector<16x32xf32> to vector<8x8xf32>
    %83 = arith.truncf %82 : vector<8x8xf32> to vector<8x8xbf16>
    %84 = vector.extract_strided_slice %19 {offsets = [0, 24], sizes = [8, 8], strides = [1, 1]} : vector<16x32xf32> to vector<8x8xf32>
    %85 = arith.truncf %84 : vector<8x8xf32> to vector<8x8xbf16>
    %cst_27 = arith.constant dense<0.000000e+00> : vector<8x8xf32>
    %86 = tpu.matmul %81, %83, %cst_27 {dimension_numbers = #tpu.dot_dimension_numbers<[1], [1], [0], [0], [0, 0, 1, 0], [], []>} : vector<8x8xbf16>, vector<8x8xbf16>, vector<8x8xf32> -> vector<8x8xf32>
    %cst_28 = arith.constant dense<0xFF800000> : vector<8xf32>
    %87 = vector.multi_reduction <maximumf>, %86, %cst_28 [1] : vector<8x8xf32> to vector<8xf32>
    %88 = vector.shape_cast %87 : vector<8xf32> to vector<8x1xf32>
    %89 = vector.broadcast %88 : vector<8x1xf32> to vector<8x8xf32>
    %90 = arith.subf %86, %89 : vector<8x8xf32>
    %91 = math.exp %90 : vector<8x8xf32>
    %cst_29 = arith.constant dense<0.000000e+00> : vector<8xf32>
    %92 = vector.multi_reduction <add>, %91, %cst_29 [1] : vector<8x8xf32> to vector<8xf32>
    %93 = vector.shape_cast %92 : vector<8xf32> to vector<8x1xf32>
    %94 = tpu.reciprocal %93 {approx = true} : vector<8x1xf32> -> vector<8x1xf32>
    %95 = vector.broadcast %94 : vector<8x1xf32> to vector<8x8xf32>
    %96 = arith.mulf %91, %95 : vector<8x8xf32>
    %97 = arith.truncf %96 : vector<8x8xf32> to vector<8x8xbf16>
    %cst_30 = arith.constant dense<0.000000e+00> : vector<8x8xf32>
    %98 = tpu.matmul %97, %85, %cst_30 {dimension_numbers = #tpu.dot_dimension_numbers<[1], [0], [0], [1], [0, 0, 1, 1], [], []>} : vector<8x8xbf16>, vector<8x8xbf16>, vector<8x8xf32> -> vector<8x8xf32>
    %c0_31 = arith.constant 0 : index
    %c24 = arith.constant 24 : index
    %99 = vector.load %arg16[%c0_31, %c24] : memref<16x32xf32, #tpu.memory_space<vmem>>, vector<8x8xf32>
    tpu.vector_store %arg16[%c0_31, %c24], %98 {strides = array<i32>} : memref<16x32xf32, #tpu.memory_space<vmem>>, vector<8x8xf32>,
    %100 = vector.extract_strided_slice %13 {offsets = [8, 0], sizes = [8, 8], strides = [1, 1]} : vector<16x32xf32> to vector<8x8xf32>
    %101 = arith.truncf %100 : vector<8x8xf32> to vector<8x8xbf16>
    %102 = vector.extract_strided_slice %16 {offsets = [8, 0], sizes = [8, 8], strides = [1, 1]} : vector<16x32xf32> to vector<8x8xf32>
    %103 = arith.truncf %102 : vector<8x8xf32> to vector<8x8xbf16>
    %104 = vector.extract_strided_slice %19 {offsets = [8, 0], sizes = [8, 8], strides = [1, 1]} : vector<16x32xf32> to vector<8x8xf32>
    %105 = arith.truncf %104 : vector<8x8xf32> to vector<8x8xbf16>
    %cst_32 = arith.constant dense<0.000000e+00> : vector<8x8xf32>
    %106 = tpu.matmul %101, %103, %cst_32 {dimension_numbers = #tpu.dot_dimension_numbers<[1], [1], [0], [0], [0, 0, 1, 0], [], []>} : vector<8x8xbf16>, vector<8x8xbf16>, vector<8x8xf32> -> vector<8x8xf32>
    %cst_33 = arith.constant dense<0xFF800000> : vector<8xf32>
    %107 = vector.multi_reduction <maximumf>, %106, %cst_33 [1] : vector<8x8xf32> to vector<8xf32>
    %108 = vector.shape_cast %107 : vector<8xf32> to vector<8x1xf32>
    %109 = vector.broadcast %108 : vector<8x1xf32> to vector<8x8xf32>
    %110 = arith.subf %106, %109 : vector<8x8xf32>
    %111 = math.exp %110 : vector<8x8xf32>
    %cst_34 = arith.constant dense<0.000000e+00> : vector<8xf32>
    %112 = vector.multi_reduction <add>, %111, %cst_34 [1] : vector<8x8xf32> to vector<8xf32>
    %113 = vector.shape_cast %112 : vector<8xf32> to vector<8x1xf32>
    %114 = tpu.reciprocal %113 {approx = true} : vector<8x1xf32> -> vector<8x1xf32>
    %115 = vector.broadcast %114 : vector<8x1xf32> to vector<8x8xf32>
    %116 = arith.mulf %111, %115 : vector<8x8xf32>
    %117 = arith.truncf %116 : vector<8x8xf32> to vector<8x8xbf16>
    %cst_35 = arith.constant dense<0.000000e+00> : vector<8x8xf32>
    %118 = tpu.matmul %117, %105, %cst_35 {dimension_numbers = #tpu.dot_dimension_numbers<[1], [0], [0], [1], [0, 0, 1, 1], [], []>} : vector<8x8xbf16>, vector<8x8xbf16>, vector<8x8xf32> -> vector<8x8xf32>
    %c8_36 = arith.constant 8 : index
    %c0_37 = arith.constant 0 : index
    %119 = vector.load %arg16[%c8_36, %c0_37] : memref<16x32xf32, #tpu.memory_space<vmem>>, vector<8x8xf32>
    tpu.vector_store %arg16[%c8_36, %c0_37], %118 {strides = array<i32>} : memref<16x32xf32, #tpu.memory_space<vmem>>, vector<8x8xf32>,
    %120 = vector.extract_strided_slice %13 {offsets = [8, 8], sizes = [8, 8], strides = [1, 1]} : vector<16x32xf32> to vector<8x8xf32>
    %121 = arith.truncf %120 : vector<8x8xf32> to vector<8x8xbf16>
    %122 = vector.extract_strided_slice %16 {offsets = [8, 8], sizes = [8, 8], strides = [1, 1]} : vector<16x32xf32> to vector<8x8xf32>
    %123 = arith.truncf %122 : vector<8x8xf32> to vector<8x8xbf16>
    %124 = vector.extract_strided_slice %19 {offsets = [8, 8], sizes = [8, 8], strides = [1, 1]} : vector<16x32xf32> to vector<8x8xf32>
    %125 = arith.truncf %124 : vector<8x8xf32> to vector<8x8xbf16>
    %cst_38 = arith.constant dense<0.000000e+00> : vector<8x8xf32>
    %126 = tpu.matmul %121, %123, %cst_38 {dimension_numbers = #tpu.dot_dimension_numbers<[1], [1], [0], [0], [0, 0, 1, 0], [], []>} : vector<8x8xbf16>, vector<8x8xbf16>, vector<8x8xf32> -> vector<8x8xf32>
    %cst_39 = arith.constant dense<0xFF800000> : vector<8xf32>
    %127 = vector.multi_reduction <maximumf>, %126, %cst_39 [1] : vector<8x8xf32> to vector<8xf32>
    %128 = vector.shape_cast %127 : vector<8xf32> to vector<8x1xf32>
    %129 = vector.broadcast %128 : vector<8x1xf32> to vector<8x8xf32>
    %130 = arith.subf %126, %129 : vector<8x8xf32>
    %131 = math.exp %130 : vector<8x8xf32>
    %cst_40 = arith.constant dense<0.000000e+00> : vector<8xf32>
    %132 = vector.multi_reduction <add>, %131, %cst_40 [1] : vector<8x8xf32> to vector<8xf32>
    %133 = vector.shape_cast %132 : vector<8xf32> to vector<8x1xf32>
    %134 = tpu.reciprocal %133 {approx = true} : vector<8x1xf32> -> vector<8x1xf32>
    %135 = vector.broadcast %134 : vector<8x1xf32> to vector<8x8xf32>
    %136 = arith.mulf %131, %135 : vector<8x8xf32>
    %137 = arith.truncf %136 : vector<8x8xf32> to vector<8x8xbf16>
    %cst_41 = arith.constant dense<0.000000e+00> : vector<8x8xf32>
    %138 = tpu.matmul %137, %125, %cst_41 {dimension_numbers = #tpu.dot_dimension_numbers<[1], [0], [0], [1], [0, 0, 1, 1], [], []>} : vector<8x8xbf16>, vector<8x8xbf16>, vector<8x8xf32> -> vector<8x8xf32>
    %c8_42 = arith.constant 8 : index
    %c8_43 = arith.constant 8 : index
    %139 = vector.load %arg16[%c8_42, %c8_43] : memref<16x32xf32, #tpu.memory_space<vmem>>, vector<8x8xf32>
    tpu.vector_store %arg16[%c8_42, %c8_43], %138 {strides = array<i32>} : memref<16x32xf32, #tpu.memory_space<vmem>>, vector<8x8xf32>,
    %140 = vector.extract_strided_slice %13 {offsets = [8, 16], sizes = [8, 8], strides = [1, 1]} : vector<16x32xf32> to vector<8x8xf32>
    %141 = arith.truncf %140 : vector<8x8xf32> to vector<8x8xbf16>
    %142 = vector.extract_strided_slice %16 {offsets = [8, 16], sizes = [8, 8], strides = [1, 1]} : vector<16x32xf32> to vector<8x8xf32>
    %143 = arith.truncf %142 : vector<8x8xf32> to vector<8x8xbf16>
    %144 = vector.extract_strided_slice %19 {offsets = [8, 16], sizes = [8, 8], strides = [1, 1]} : vector<16x32xf32> to vector<8x8xf32>
    %145 = arith.truncf %144 : vector<8x8xf32> to vector<8x8xbf16>
    %cst_44 = arith.constant dense<0.000000e+00> : vector<8x8xf32>
    %146 = tpu.matmul %141, %143, %cst_44 {dimension_numbers = #tpu.dot_dimension_numbers<[1], [1], [0], [0], [0, 0, 1, 0], [], []>} : vector<8x8xbf16>, vector<8x8xbf16>, vector<8x8xf32> -> vector<8x8xf32>
    %cst_45 = arith.constant dense<0xFF800000> : vector<8xf32>
    %147 = vector.multi_reduction <maximumf>, %146, %cst_45 [1] : vector<8x8xf32> to vector<8xf32>
    %148 = vector.shape_cast %147 : vector<8xf32> to vector<8x1xf32>
    %149 = vector.broadcast %148 : vector<8x1xf32> to vector<8x8xf32>
    %150 = arith.subf %146, %149 : vector<8x8xf32>
    %151 = math.exp %150 : vector<8x8xf32>
    %cst_46 = arith.constant dense<0.000000e+00> : vector<8xf32>
    %152 = vector.multi_reduction <add>, %151, %cst_46 [1] : vector<8x8xf32> to vector<8xf32>
    %153 = vector.shape_cast %152 : vector<8xf32> to vector<8x1xf32>
    %154 = tpu.reciprocal %153 {approx = true} : vector<8x1xf32> -> vector<8x1xf32>
    %155 = vector.broadcast %154 : vector<8x1xf32> to vector<8x8xf32>
    %156 = arith.mulf %151, %155 : vector<8x8xf32>
    %157 = arith.truncf %156 : vector<8x8xf32> to vector<8x8xbf16>
    %cst_47 = arith.constant dense<0.000000e+00> : vector<8x8xf32>
    %158 = tpu.matmul %157, %145, %cst_47 {dimension_numbers = #tpu.dot_dimension_numbers<[1], [0], [0], [1], [0, 0, 1, 1], [], []>} : vector<8x8xbf16>, vector<8x8xbf16>, vector<8x8xf32> -> vector<8x8xf32>
    %c8_48 = arith.constant 8 : index
    %c16_49 = arith.constant 16 : index
    %159 = vector.load %arg16[%c8_48, %c16_49] : memref<16x32xf32, #tpu.memory_space<vmem>>, vector<8x8xf32>
    tpu.vector_store %arg16[%c8_48, %c16_49], %158 {strides = array<i32>} : memref<16x32xf32, #tpu.memory_space<vmem>>, vector<8x8xf32>,
    %160 = vector.extract_strided_slice %13 {offsets = [8, 24], sizes = [8, 8], strides = [1, 1]} : vector<16x32xf32> to vector<8x8xf32>
    %161 = arith.truncf %160 : vector<8x8xf32> to vector<8x8xbf16>
    %162 = vector.extract_strided_slice %16 {offsets = [8, 24], sizes = [8, 8], strides = [1, 1]} : vector<16x32xf32> to vector<8x8xf32>
    %163 = arith.truncf %162 : vector<8x8xf32> to vector<8x8xbf16>
    %164 = vector.extract_strided_slice %19 {offsets = [8, 24], sizes = [8, 8], strides = [1, 1]} : vector<16x32xf32> to vector<8x8xf32>
    %165 = arith.truncf %164 : vector<8x8xf32> to vector<8x8xbf16>
    %cst_50 = arith.constant dense<0.000000e+00> : vector<8x8xf32>
    %166 = tpu.matmul %161, %163, %cst_50 {dimension_numbers = #tpu.dot_dimension_numbers<[1], [1], [0], [0], [0, 0, 1, 0], [], []>} : vector<8x8xbf16>, vector<8x8xbf16>, vector<8x8xf32> -> vector<8x8xf32>
    %cst_51 = arith.constant dense<0xFF800000> : vector<8xf32>
    %167 = vector.multi_reduction <maximumf>, %166, %cst_51 [1] : vector<8x8xf32> to vector<8xf32>
    %168 = vector.shape_cast %167 : vector<8xf32> to vector<8x1xf32>
    %169 = vector.broadcast %168 : vector<8x1xf32> to vector<8x8xf32>
    %170 = arith.subf %166, %169 : vector<8x8xf32>
    %171 = math.exp %170 : vector<8x8xf32>
    %cst_52 = arith.constant dense<0.000000e+00> : vector<8xf32>
    %172 = vector.multi_reduction <add>, %171, %cst_52 [1] : vector<8x8xf32> to vector<8xf32>
    %173 = vector.shape_cast %172 : vector<8xf32> to vector<8x1xf32>
    %174 = tpu.reciprocal %173 {approx = true} : vector<8x1xf32> -> vector<8x1xf32>
    %175 = vector.broadcast %174 : vector<8x1xf32> to vector<8x8xf32>
    %176 = arith.mulf %171, %175 : vector<8x8xf32>
    %177 = arith.truncf %176 : vector<8x8xf32> to vector<8x8xbf16>
    %cst_53 = arith.constant dense<0.000000e+00> : vector<8x8xf32>
    %178 = tpu.matmul %177, %165, %cst_53 {dimension_numbers = #tpu.dot_dimension_numbers<[1], [0], [0], [1], [0, 0, 1, 1], [], []>} : vector<8x8xbf16>, vector<8x8xbf16>, vector<8x8xf32> -> vector<8x8xf32>
    %c8_54 = arith.constant 8 : index
    %c24_55 = arith.constant 24 : index
    %179 = vector.load %arg16[%c8_54, %c24_55] : memref<16x32xf32, #tpu.memory_space<vmem>>, vector<8x8xf32>
    tpu.vector_store %arg16[%c8_54, %c24_55], %178 {strides = array<i32>} : memref<16x32xf32, #tpu.memory_space<vmem>>, vector<8x8xf32>,
    %c0_56 = arith.constant 0 : index
    %c0_57 = arith.constant 0 : index
    %180 = vector.load %arg16[%c0_56, %c0_57] : memref<16x32xf32, #tpu.memory_space<vmem>>, vector<16x32xf32>
    %181 = arith.truncf %180 : vector<16x32xf32> to vector<16x32xbf16>
    %c0_58 = arith.constant 0 : index
    %c0_59 = arith.constant 0 : index
    %182 = vector.load %arg6[%c0_58, %c0_59] : memref<32x32xbf16, #tpu.memory_space<vmem>>, vector<32x32xbf16>
    %cst_60 = arith.constant dense<0.000000e+00> : vector<16x32xf32>
    %183 = tpu.matmul %181, %182, %cst_60 {dimension_numbers = #tpu.dot_dimension_numbers<[1], [0], [0], [1], [0, 0, 1, 1], [], []>} : vector<16x32xbf16>, vector<32x32xbf16>, vector<16x32xf32> -> vector<16x32xf32>
    %184 = vector.broadcast %1 : vector<1x32xf32> to vector<16x32xf32>
    %185 = arith.addf %183, %184 : vector<16x32xf32>
    %186 = arith.addf %185, %10 : vector<16x32xf32>
    %cst_61 = arith.constant dense<0.000000e+00> : vector<16xf32>
    %187 = vector.multi_reduction <add>, %186, %cst_61 [1] : vector<16x32xf32> to vector<16xf32>
    %188 = vector.shape_cast %187 : vector<16xf32> to vector<16x1xf32>
    %cst_62 = arith.constant 3.200000e+01 : f32
    %189 = vector.broadcast %cst_62 : f32 to vector<16x1xf32>
    %190 = arith.divf %188, %189 : vector<16x1xf32>
    %191 = vector.broadcast %190 : vector<16x1xf32> to vector<16x32xf32>
    %192 = arith.subf %186, %191 : vector<16x32xf32>
    %193 = arith.mulf %192, %192 : vector<16x32xf32>
    %cst_63 = arith.constant dense<0.000000e+00> : vector<16xf32>
    %194 = vector.multi_reduction <add>, %193, %cst_63 [1] : vector<16x32xf32> to vector<16xf32>
    %195 = vector.shape_cast %194 : vector<16xf32> to vector<16x1xf32>
    %cst_64 = arith.constant 3.200000e+01 : f32
    %196 = vector.broadcast %cst_64 : f32 to vector<16x1xf32>
    %197 = arith.divf %195, %196 : vector<16x1xf32>
    %198 = vector.broadcast %190 : vector<16x1xf32> to vector<16x32xf32>
    %199 = arith.subf %186, %198 : vector<16x32xf32>
    %cst_65 = arith.constant 9.99999974E-6 : f32
    %200 = vector.broadcast %cst_65 : f32 to vector<16x1xf32>
    %201 = arith.addf %197, %200 : vector<16x1xf32>
    %202 = math.rsqrt %201 : vector<16x1xf32>
    %203 = vector.broadcast %202 : vector<16x1xf32> to vector<16x32xf32>
    %204 = arith.mulf %199, %203 : vector<16x32xf32>
    %205 = vector.broadcast %2 : vector<1x32xf32> to vector<16x32xf32>
    %206 = arith.mulf %204, %205 : vector<16x32xf32>
    %207 = vector.broadcast %3 : vector<1x32xf32> to vector<16x32xf32>
    %208 = arith.addf %206, %207 : vector<16x32xf32>
    %c0_66 = arith.constant 0 : index
    %c0_67 = arith.constant 0 : index
    %209 = vector.load %arg1[%c0_66, %c0_67] : memref<16x32xf32, #tpu.memory_space<vmem>>, vector<16x32xf32>
    %c0_68 = arith.constant 0 : index
    %c0_69 = arith.constant 0 : index
    %210 = vector.load %arg2[%c0_68, %c0_69] : memref<16x32xf32, #tpu.memory_space<vmem>>, vector<16x32xf32>
    %211 = arith.truncf %208 : vector<16x32xf32> to vector<16x32xbf16>
    %c0_70 = arith.constant 0 : index
    %c0_71 = arith.constant 0 : index
    %212 = vector.load %arg7[%c0_70, %c0_71] : memref<32x32xbf16, #tpu.memory_space<vmem>>, vector<32x32xbf16>
    %cst_72 = arith.constant dense<0.000000e+00> : vector<16x32xf32>
    %213 = tpu.matmul %211, %212, %cst_72 {dimension_numbers = #tpu.dot_dimension_numbers<[1], [0], [0], [1], [0, 0, 1, 1], [], []>} : vector<16x32xbf16>, vector<32x32xbf16>, vector<16x32xf32> -> vector<16x32xf32>
    %214 = arith.truncf %210 : vector<16x32xf32> to vector<16x32xbf16>
    %c0_73 = arith.constant 0 : index
    %c0_74 = arith.constant 0 : index
    %215 = vector.load %arg8[%c0_73, %c0_74] : memref<32x32xbf16, #tpu.memory_space<vmem>>, vector<32x32xbf16>
    %cst_75 = arith.constant dense<0.000000e+00> : vector<16x32xf32>
    %216 = tpu.matmul %214, %215, %cst_75 {dimension_numbers = #tpu.dot_dimension_numbers<[1], [0], [0], [1], [0, 0, 1, 1], [], []>} : vector<16x32xbf16>, vector<32x32xbf16>, vector<16x32xf32> -> vector<16x32xf32>
    %217 = arith.truncf %209 : vector<16x32xf32> to vector<16x32xbf16>
    %c0_76 = arith.constant 0 : index
    %c0_77 = arith.constant 0 : index
    %218 = vector.load %arg9[%c0_76, %c0_77] : memref<32x32xbf16, #tpu.memory_space<vmem>>, vector<32x32xbf16>
    %cst_78 = arith.constant dense<0.000000e+00> : vector<16x32xf32>
    %219 = tpu.matmul %217, %218, %cst_78 {dimension_numbers = #tpu.dot_dimension_numbers<[1], [0], [0], [1], [0, 0, 1, 1], [], []>} : vector<16x32xbf16>, vector<32x32xbf16>, vector<16x32xf32> -> vector<16x32xf32>
    %220 = vector.extract_strided_slice %213 {offsets = [0, 0], sizes = [8, 8], strides = [1, 1]} : vector<16x32xf32> to vector<8x8xf32>
    %221 = arith.truncf %220 : vector<8x8xf32> to vector<8x8xbf16>
    %222 = vector.extract_strided_slice %216 {offsets = [0, 0], sizes = [8, 8], strides = [1, 1]} : vector<16x32xf32> to vector<8x8xf32>
    %223 = arith.truncf %222 : vector<8x8xf32> to vector<8x8xbf16>
    %224 = vector.extract_strided_slice %219 {offsets = [0, 0], sizes = [8, 8], strides = [1, 1]} : vector<16x32xf32> to vector<8x8xf32>
    %225 = arith.truncf %224 : vector<8x8xf32> to vector<8x8xbf16>
    %cst_79 = arith.constant dense<0.000000e+00> : vector<8x8xf32>
    %226 = tpu.matmul %221, %223, %cst_79 {dimension_numbers = #tpu.dot_dimension_numbers<[1], [1], [0], [0], [0, 0, 1, 0], [], []>} : vector<8x8xbf16>, vector<8x8xbf16>, vector<8x8xf32> -> vector<8x8xf32>
    %cst_80 = arith.constant dense<0xFF800000> : vector<8xf32>
    %227 = vector.multi_reduction <maximumf>, %226, %cst_80 [1] : vector<8x8xf32> to vector<8xf32>
    %228 = vector.shape_cast %227 : vector<8xf32> to vector<8x1xf32>
    %229 = vector.broadcast %228 : vector<8x1xf32> to vector<8x8xf32>
    %230 = arith.subf %226, %229 : vector<8x8xf32>
    %231 = math.exp %230 : vector<8x8xf32>
    %cst_81 = arith.constant dense<0.000000e+00> : vector<8xf32>
    %232 = vector.multi_reduction <add>, %231, %cst_81 [1] : vector<8x8xf32> to vector<8xf32>
    %233 = vector.shape_cast %232 : vector<8xf32> to vector<8x1xf32>
    %234 = tpu.reciprocal %233 {approx = true} : vector<8x1xf32> -> vector<8x1xf32>
    %235 = vector.broadcast %234 : vector<8x1xf32> to vector<8x8xf32>
    %236 = arith.mulf %231, %235 : vector<8x8xf32>
    %237 = arith.truncf %236 : vector<8x8xf32> to vector<8x8xbf16>
    %cst_82 = arith.constant dense<0.000000e+00> : vector<8x8xf32>
    %238 = tpu.matmul %237, %225, %cst_82 {dimension_numbers = #tpu.dot_dimension_numbers<[1], [0], [0], [1], [0, 0, 1, 1], [], []>} : vector<8x8xbf16>, vector<8x8xbf16>, vector<8x8xf32> -> vector<8x8xf32>
    %c0_83 = arith.constant 0 : index
    %c0_84 = arith.constant 0 : index
    %239 = vector.load %arg16[%c0_83, %c0_84] : memref<16x32xf32, #tpu.memory_space<vmem>>, vector<8x8xf32>
    tpu.vector_store %arg16[%c0_83, %c0_84], %238 {strides = array<i32>} : memref<16x32xf32, #tpu.memory_space<vmem>>, vector<8x8xf32>,
    %240 = vector.extract_strided_slice %213 {offsets = [0, 8], sizes = [8, 8], strides = [1, 1]} : vector<16x32xf32> to vector<8x8xf32>
    %241 = arith.truncf %240 : vector<8x8xf32> to vector<8x8xbf16>
    %242 = vector.extract_strided_slice %216 {offsets = [0, 8], sizes = [8, 8], strides = [1, 1]} : vector<16x32xf32> to vector<8x8xf32>
    %243 = arith.truncf %242 : vector<8x8xf32> to vector<8x8xbf16>
    %244 = vector.extract_strided_slice %219 {offsets = [0, 8], sizes = [8, 8], strides = [1, 1]} : vector<16x32xf32> to vector<8x8xf32>
    %245 = arith.truncf %244 : vector<8x8xf32> to vector<8x8xbf16>
    %cst_85 = arith.constant dense<0.000000e+00> : vector<8x8xf32>
    %246 = tpu.matmul %241, %243, %cst_85 {dimension_numbers = #tpu.dot_dimension_numbers<[1], [1], [0], [0], [0, 0, 1, 0], [], []>} : vector<8x8xbf16>, vector<8x8xbf16>, vector<8x8xf32> -> vector<8x8xf32>
    %cst_86 = arith.constant dense<0xFF800000> : vector<8xf32>
    %247 = vector.multi_reduction <maximumf>, %246, %cst_86 [1] : vector<8x8xf32> to vector<8xf32>
    %248 = vector.shape_cast %247 : vector<8xf32> to vector<8x1xf32>
    %249 = vector.broadcast %248 : vector<8x1xf32> to vector<8x8xf32>
    %250 = arith.subf %246, %249 : vector<8x8xf32>
    %251 = math.exp %250 : vector<8x8xf32>
    %cst_87 = arith.constant dense<0.000000e+00> : vector<8xf32>
    %252 = vector.multi_reduction <add>, %251, %cst_87 [1] : vector<8x8xf32> to vector<8xf32>
    %253 = vector.shape_cast %252 : vector<8xf32> to vector<8x1xf32>
    %254 = tpu.reciprocal %253 {approx = true} : vector<8x1xf32> -> vector<8x1xf32>
    %255 = vector.broadcast %254 : vector<8x1xf32> to vector<8x8xf32>
    %256 = arith.mulf %251, %255 : vector<8x8xf32>
    %257 = arith.truncf %256 : vector<8x8xf32> to vector<8x8xbf16>
    %cst_88 = arith.constant dense<0.000000e+00> : vector<8x8xf32>
    %258 = tpu.matmul %257, %245, %cst_88 {dimension_numbers = #tpu.dot_dimension_numbers<[1], [0], [0], [1], [0, 0, 1, 1], [], []>} : vector<8x8xbf16>, vector<8x8xbf16>, vector<8x8xf32> -> vector<8x8xf32>
    %c0_89 = arith.constant 0 : index
    %c8_90 = arith.constant 8 : index
    %259 = vector.load %arg16[%c0_89, %c8_90] : memref<16x32xf32, #tpu.memory_space<vmem>>, vector<8x8xf32>
    tpu.vector_store %arg16[%c0_89, %c8_90], %258 {strides = array<i32>} : memref<16x32xf32, #tpu.memory_space<vmem>>, vector<8x8xf32>,
    %260 = vector.extract_strided_slice %213 {offsets = [0, 16], sizes = [8, 8], strides = [1, 1]} : vector<16x32xf32> to vector<8x8xf32>
    %261 = arith.truncf %260 : vector<8x8xf32> to vector<8x8xbf16>
    %262 = vector.extract_strided_slice %216 {offsets = [0, 16], sizes = [8, 8], strides = [1, 1]} : vector<16x32xf32> to vector<8x8xf32>
    %263 = arith.truncf %262 : vector<8x8xf32> to vector<8x8xbf16>
    %264 = vector.extract_strided_slice %219 {offsets = [0, 16], sizes = [8, 8], strides = [1, 1]} : vector<16x32xf32> to vector<8x8xf32>
    %265 = arith.truncf %264 : vector<8x8xf32> to vector<8x8xbf16>
    %cst_91 = arith.constant dense<0.000000e+00> : vector<8x8xf32>
    %266 = tpu.matmul %261, %263, %cst_91 {dimension_numbers = #tpu.dot_dimension_numbers<[1], [1], [0], [0], [0, 0, 1, 0], [], []>} : vector<8x8xbf16>, vector<8x8xbf16>, vector<8x8xf32> -> vector<8x8xf32>
    %cst_92 = arith.constant dense<0xFF800000> : vector<8xf32>
    %267 = vector.multi_reduction <maximumf>, %266, %cst_92 [1] : vector<8x8xf32> to vector<8xf32>
    %268 = vector.shape_cast %267 : vector<8xf32> to vector<8x1xf32>
    %269 = vector.broadcast %268 : vector<8x1xf32> to vector<8x8xf32>
    %270 = arith.subf %266, %269 : vector<8x8xf32>
    %271 = math.exp %270 : vector<8x8xf32>
    %cst_93 = arith.constant dense<0.000000e+00> : vector<8xf32>
    %272 = vector.multi_reduction <add>, %271, %cst_93 [1] : vector<8x8xf32> to vector<8xf32>
    %273 = vector.shape_cast %272 : vector<8xf32> to vector<8x1xf32>
    %274 = tpu.reciprocal %273 {approx = true} : vector<8x1xf32> -> vector<8x1xf32>
    %275 = vector.broadcast %274 : vector<8x1xf32> to vector<8x8xf32>
    %276 = arith.mulf %271, %275 : vector<8x8xf32>
    %277 = arith.truncf %276 : vector<8x8xf32> to vector<8x8xbf16>
    %cst_94 = arith.constant dense<0.000000e+00> : vector<8x8xf32>
    %278 = tpu.matmul %277, %265, %cst_94 {dimension_numbers = #tpu.dot_dimension_numbers<[1], [0], [0], [1], [0, 0, 1, 1], [], []>} : vector<8x8xbf16>, vector<8x8xbf16>, vector<8x8xf32> -> vector<8x8xf32>
    %c0_95 = arith.constant 0 : index
    %c16_96 = arith.constant 16 : index
    %279 = vector.load %arg16[%c0_95, %c16_96] : memref<16x32xf32, #tpu.memory_space<vmem>>, vector<8x8xf32>
    tpu.vector_store %arg16[%c0_95, %c16_96], %278 {strides = array<i32>} : memref<16x32xf32, #tpu.memory_space<vmem>>, vector<8x8xf32>,
    %280 = vector.extract_strided_slice %213 {offsets = [0, 24], sizes = [8, 8], strides = [1, 1]} : vector<16x32xf32> to vector<8x8xf32>
    %281 = arith.truncf %280 : vector<8x8xf32> to vector<8x8xbf16>
    %282 = vector.extract_strided_slice %216 {offsets = [0, 24], sizes = [8, 8], strides = [1, 1]} : vector<16x32xf32> to vector<8x8xf32>
    %283 = arith.truncf %282 : vector<8x8xf32> to vector<8x8xbf16>
    %284 = vector.extract_strided_slice %219 {offsets = [0, 24], sizes = [8, 8], strides = [1, 1]} : vector<16x32xf32> to vector<8x8xf32>
    %285 = arith.truncf %284 : vector<8x8xf32> to vector<8x8xbf16>
    %cst_97 = arith.constant dense<0.000000e+00> : vector<8x8xf32>
    %286 = tpu.matmul %281, %283, %cst_97 {dimension_numbers = #tpu.dot_dimension_numbers<[1], [1], [0], [0], [0, 0, 1, 0], [], []>} : vector<8x8xbf16>, vector<8x8xbf16>, vector<8x8xf32> -> vector<8x8xf32>
    %cst_98 = arith.constant dense<0xFF800000> : vector<8xf32>
    %287 = vector.multi_reduction <maximumf>, %286, %cst_98 [1] : vector<8x8xf32> to vector<8xf32>
    %288 = vector.shape_cast %287 : vector<8xf32> to vector<8x1xf32>
    %289 = vector.broadcast %288 : vector<8x1xf32> to vector<8x8xf32>
    %290 = arith.subf %286, %289 : vector<8x8xf32>
    %291 = math.exp %290 : vector<8x8xf32>
    %cst_99 = arith.constant dense<0.000000e+00> : vector<8xf32>
    %292 = vector.multi_reduction <add>, %291, %cst_99 [1] : vector<8x8xf32> to vector<8xf32>
    %293 = vector.shape_cast %292 : vector<8xf32> to vector<8x1xf32>
    %294 = tpu.reciprocal %293 {approx = true} : vector<8x1xf32> -> vector<8x1xf32>
    %295 = vector.broadcast %294 : vector<8x1xf32> to vector<8x8xf32>
    %296 = arith.mulf %291, %295 : vector<8x8xf32>
    %297 = arith.truncf %296 : vector<8x8xf32> to vector<8x8xbf16>
    %cst_100 = arith.constant dense<0.000000e+00> : vector<8x8xf32>
    %298 = tpu.matmul %297, %285, %cst_100 {dimension_numbers = #tpu.dot_dimension_numbers<[1], [0], [0], [1], [0, 0, 1, 1], [], []>} : vector<8x8xbf16>, vector<8x8xbf16>, vector<8x8xf32> -> vector<8x8xf32>
    %c0_101 = arith.constant 0 : index
    %c24_102 = arith.constant 24 : index
    %299 = vector.load %arg16[%c0_101, %c24_102] : memref<16x32xf32, #tpu.memory_space<vmem>>, vector<8x8xf32>
    tpu.vector_store %arg16[%c0_101, %c24_102], %298 {strides = array<i32>} : memref<16x32xf32, #tpu.memory_space<vmem>>, vector<8x8xf32>,
    %300 = vector.extract_strided_slice %213 {offsets = [8, 0], sizes = [8, 8], strides = [1, 1]} : vector<16x32xf32> to vector<8x8xf32>
    %301 = arith.truncf %300 : vector<8x8xf32> to vector<8x8xbf16>
    %302 = vector.extract_strided_slice %216 {offsets = [8, 0], sizes = [8, 8], strides = [1, 1]} : vector<16x32xf32> to vector<8x8xf32>
    %303 = arith.truncf %302 : vector<8x8xf32> to vector<8x8xbf16>
    %304 = vector.extract_strided_slice %219 {offsets = [8, 0], sizes = [8, 8], strides = [1, 1]} : vector<16x32xf32> to vector<8x8xf32>
    %305 = arith.truncf %304 : vector<8x8xf32> to vector<8x8xbf16>
    %cst_103 = arith.constant dense<0.000000e+00> : vector<8x8xf32>
    %306 = tpu.matmul %301, %303, %cst_103 {dimension_numbers = #tpu.dot_dimension_numbers<[1], [1], [0], [0], [0, 0, 1, 0], [], []>} : vector<8x8xbf16>, vector<8x8xbf16>, vector<8x8xf32> -> vector<8x8xf32>
    %cst_104 = arith.constant dense<0xFF800000> : vector<8xf32>
    %307 = vector.multi_reduction <maximumf>, %306, %cst_104 [1] : vector<8x8xf32> to vector<8xf32>
    %308 = vector.shape_cast %307 : vector<8xf32> to vector<8x1xf32>
    %309 = vector.broadcast %308 : vector<8x1xf32> to vector<8x8xf32>
    %310 = arith.subf %306, %309 : vector<8x8xf32>
    %311 = math.exp %310 : vector<8x8xf32>
    %cst_105 = arith.constant dense<0.000000e+00> : vector<8xf32>
    %312 = vector.multi_reduction <add>, %311, %cst_105 [1] : vector<8x8xf32> to vector<8xf32>
    %313 = vector.shape_cast %312 : vector<8xf32> to vector<8x1xf32>
    %314 = tpu.reciprocal %313 {approx = true} : vector<8x1xf32> -> vector<8x1xf32>
    %315 = vector.broadcast %314 : vector<8x1xf32> to vector<8x8xf32>
    %316 = arith.mulf %311, %315 : vector<8x8xf32>
    %317 = arith.truncf %316 : vector<8x8xf32> to vector<8x8xbf16>
    %cst_106 = arith.constant dense<0.000000e+00> : vector<8x8xf32>
    %318 = tpu.matmul %317, %305, %cst_106 {dimension_numbers = #tpu.dot_dimension_numbers<[1], [0], [0], [1], [0, 0, 1, 1], [], []>} : vector<8x8xbf16>, vector<8x8xbf16>, vector<8x8xf32> -> vector<8x8xf32>
    %c8_107 = arith.constant 8 : index
    %c0_108 = arith.constant 0 : index
    %319 = vector.load %arg16[%c8_107, %c0_108] : memref<16x32xf32, #tpu.memory_space<vmem>>, vector<8x8xf32>
    tpu.vector_store %arg16[%c8_107, %c0_108], %318 {strides = array<i32>} : memref<16x32xf32, #tpu.memory_space<vmem>>, vector<8x8xf32>,
    %320 = vector.extract_strided_slice %213 {offsets = [8, 8], sizes = [8, 8], strides = [1, 1]} : vector<16x32xf32> to vector<8x8xf32>
    %321 = arith.truncf %320 : vector<8x8xf32> to vector<8x8xbf16>
    %322 = vector.extract_strided_slice %216 {offsets = [8, 8], sizes = [8, 8], strides = [1, 1]} : vector<16x32xf32> to vector<8x8xf32>
    %323 = arith.truncf %322 : vector<8x8xf32> to vector<8x8xbf16>
    %324 = vector.extract_strided_slice %219 {offsets = [8, 8], sizes = [8, 8], strides = [1, 1]} : vector<16x32xf32> to vector<8x8xf32>
    %325 = arith.truncf %324 : vector<8x8xf32> to vector<8x8xbf16>
    %cst_109 = arith.constant dense<0.000000e+00> : vector<8x8xf32>
    %326 = tpu.matmul %321, %323, %cst_109 {dimension_numbers = #tpu.dot_dimension_numbers<[1], [1], [0], [0], [0, 0, 1, 0], [], []>} : vector<8x8xbf16>, vector<8x8xbf16>, vector<8x8xf32> -> vector<8x8xf32>
    %cst_110 = arith.constant dense<0xFF800000> : vector<8xf32>
    %327 = vector.multi_reduction <maximumf>, %326, %cst_110 [1] : vector<8x8xf32> to vector<8xf32>
    %328 = vector.shape_cast %327 : vector<8xf32> to vector<8x1xf32>
    %329 = vector.broadcast %328 : vector<8x1xf32> to vector<8x8xf32>
    %330 = arith.subf %326, %329 : vector<8x8xf32>
    %331 = math.exp %330 : vector<8x8xf32>
    %cst_111 = arith.constant dense<0.000000e+00> : vector<8xf32>
    %332 = vector.multi_reduction <add>, %331, %cst_111 [1] : vector<8x8xf32> to vector<8xf32>
    %333 = vector.shape_cast %332 : vector<8xf32> to vector<8x1xf32>
    %334 = tpu.reciprocal %333 {approx = true} : vector<8x1xf32> -> vector<8x1xf32>
    %335 = vector.broadcast %334 : vector<8x1xf32> to vector<8x8xf32>
    %336 = arith.mulf %331, %335 : vector<8x8xf32>
    %337 = arith.truncf %336 : vector<8x8xf32> to vector<8x8xbf16>
    %cst_112 = arith.constant dense<0.000000e+00> : vector<8x8xf32>
    %338 = tpu.matmul %337, %325, %cst_112 {dimension_numbers = #tpu.dot_dimension_numbers<[1], [0], [0], [1], [0, 0, 1, 1], [], []>} : vector<8x8xbf16>, vector<8x8xbf16>, vector<8x8xf32> -> vector<8x8xf32>
    %c8_113 = arith.constant 8 : index
    %c8_114 = arith.constant 8 : index
    %339 = vector.load %arg16[%c8_113, %c8_114] : memref<16x32xf32, #tpu.memory_space<vmem>>, vector<8x8xf32>
    tpu.vector_store %arg16[%c8_113, %c8_114], %338 {strides = array<i32>} : memref<16x32xf32, #tpu.memory_space<vmem>>, vector<8x8xf32>,
    %340 = vector.extract_strided_slice %213 {offsets = [8, 16], sizes = [8, 8], strides = [1, 1]} : vector<16x32xf32> to vector<8x8xf32>
    %341 = arith.truncf %340 : vector<8x8xf32> to vector<8x8xbf16>
    %342 = vector.extract_strided_slice %216 {offsets = [8, 16], sizes = [8, 8], strides = [1, 1]} : vector<16x32xf32> to vector<8x8xf32>
    %343 = arith.truncf %342 : vector<8x8xf32> to vector<8x8xbf16>
    %344 = vector.extract_strided_slice %219 {offsets = [8, 16], sizes = [8, 8], strides = [1, 1]} : vector<16x32xf32> to vector<8x8xf32>
    %345 = arith.truncf %344 : vector<8x8xf32> to vector<8x8xbf16>
    %cst_115 = arith.constant dense<0.000000e+00> : vector<8x8xf32>
    %346 = tpu.matmul %341, %343, %cst_115 {dimension_numbers = #tpu.dot_dimension_numbers<[1], [1], [0], [0], [0, 0, 1, 0], [], []>} : vector<8x8xbf16>, vector<8x8xbf16>, vector<8x8xf32> -> vector<8x8xf32>
    %cst_116 = arith.constant dense<0xFF800000> : vector<8xf32>
    %347 = vector.multi_reduction <maximumf>, %346, %cst_116 [1] : vector<8x8xf32> to vector<8xf32>
    %348 = vector.shape_cast %347 : vector<8xf32> to vector<8x1xf32>
    %349 = vector.broadcast %348 : vector<8x1xf32> to vector<8x8xf32>
    %350 = arith.subf %346, %349 : vector<8x8xf32>
    %351 = math.exp %350 : vector<8x8xf32>
    %cst_117 = arith.constant dense<0.000000e+00> : vector<8xf32>
    %352 = vector.multi_reduction <add>, %351, %cst_117 [1] : vector<8x8xf32> to vector<8xf32>
    %353 = vector.shape_cast %352 : vector<8xf32> to vector<8x1xf32>
    %354 = tpu.reciprocal %353 {approx = true} : vector<8x1xf32> -> vector<8x1xf32>
    %355 = vector.broadcast %354 : vector<8x1xf32> to vector<8x8xf32>
    %356 = arith.mulf %351, %355 : vector<8x8xf32>
    %357 = arith.truncf %356 : vector<8x8xf32> to vector<8x8xbf16>
    %cst_118 = arith.constant dense<0.000000e+00> : vector<8x8xf32>
    %358 = tpu.matmul %357, %345, %cst_118 {dimension_numbers = #tpu.dot_dimension_numbers<[1], [0], [0], [1], [0, 0, 1, 1], [], []>} : vector<8x8xbf16>, vector<8x8xbf16>, vector<8x8xf32> -> vector<8x8xf32>
    %c8_119 = arith.constant 8 : index
    %c16_120 = arith.constant 16 : index
    %359 = vector.load %arg16[%c8_119, %c16_120] : memref<16x32xf32, #tpu.memory_space<vmem>>, vector<8x8xf32>
    tpu.vector_store %arg16[%c8_119, %c16_120], %358 {strides = array<i32>} : memref<16x32xf32, #tpu.memory_space<vmem>>, vector<8x8xf32>,
    %360 = vector.extract_strided_slice %213 {offsets = [8, 24], sizes = [8, 8], strides = [1, 1]} : vector<16x32xf32> to vector<8x8xf32>
    %361 = arith.truncf %360 : vector<8x8xf32> to vector<8x8xbf16>
    %362 = vector.extract_strided_slice %216 {offsets = [8, 24], sizes = [8, 8], strides = [1, 1]} : vector<16x32xf32> to vector<8x8xf32>
    %363 = arith.truncf %362 : vector<8x8xf32> to vector<8x8xbf16>
    %364 = vector.extract_strided_slice %219 {offsets = [8, 24], sizes = [8, 8], strides = [1, 1]} : vector<16x32xf32> to vector<8x8xf32>
    %365 = arith.truncf %364 : vector<8x8xf32> to vector<8x8xbf16>
    %cst_121 = arith.constant dense<0.000000e+00> : vector<8x8xf32>
    %366 = tpu.matmul %361, %363, %cst_121 {dimension_numbers = #tpu.dot_dimension_numbers<[1], [1], [0], [0], [0, 0, 1, 0], [], []>} : vector<8x8xbf16>, vector<8x8xbf16>, vector<8x8xf32> -> vector<8x8xf32>
    %cst_122 = arith.constant dense<0xFF800000> : vector<8xf32>
    %367 = vector.multi_reduction <maximumf>, %366, %cst_122 [1] : vector<8x8xf32> to vector<8xf32>
    %368 = vector.shape_cast %367 : vector<8xf32> to vector<8x1xf32>
    %369 = vector.broadcast %368 : vector<8x1xf32> to vector<8x8xf32>
    %370 = arith.subf %366, %369 : vector<8x8xf32>
    %371 = math.exp %370 : vector<8x8xf32>
    %cst_123 = arith.constant dense<0.000000e+00> : vector<8xf32>
    %372 = vector.multi_reduction <add>, %371, %cst_123 [1] : vector<8x8xf32> to vector<8xf32>
    %373 = vector.shape_cast %372 : vector<8xf32> to vector<8x1xf32>
    %374 = tpu.reciprocal %373 {approx = true} : vector<8x1xf32> -> vector<8x1xf32>
    %375 = vector.broadcast %374 : vector<8x1xf32> to vector<8x8xf32>
    %376 = arith.mulf %371, %375 : vector<8x8xf32>
    %377 = arith.truncf %376 : vector<8x8xf32> to vector<8x8xbf16>
    %cst_124 = arith.constant dense<0.000000e+00> : vector<8x8xf32>
    %378 = tpu.matmul %377, %365, %cst_124 {dimension_numbers = #tpu.dot_dimension_numbers<[1], [0], [0], [1], [0, 0, 1, 1], [], []>} : vector<8x8xbf16>, vector<8x8xbf16>, vector<8x8xf32> -> vector<8x8xf32>
    %c8_125 = arith.constant 8 : index
    %c24_126 = arith.constant 24 : index
    %379 = vector.load %arg16[%c8_125, %c24_126] : memref<16x32xf32, #tpu.memory_space<vmem>>, vector<8x8xf32>
    tpu.vector_store %arg16[%c8_125, %c24_126], %378 {strides = array<i32>} : memref<16x32xf32, #tpu.memory_space<vmem>>, vector<8x8xf32>,
    %c0_127 = arith.constant 0 : index
    %c0_128 = arith.constant 0 : index
    %380 = vector.load %arg16[%c0_127, %c0_128] : memref<16x32xf32, #tpu.memory_space<vmem>>, vector<16x32xf32>
    %381 = arith.truncf %380 : vector<16x32xf32> to vector<16x32xbf16>
    %c0_129 = arith.constant 0 : index
    %c0_130 = arith.constant 0 : index
    %382 = vector.load %arg10[%c0_129, %c0_130] : memref<32x32xbf16, #tpu.memory_space<vmem>>, vector<32x32xbf16>
    %cst_131 = arith.constant dense<0.000000e+00> : vector<16x32xf32>
    %383 = tpu.matmul %381, %382, %cst_131 {dimension_numbers = #tpu.dot_dimension_numbers<[1], [0], [0], [1], [0, 0, 1, 1], [], []>} : vector<16x32xbf16>, vector<32x32xbf16>, vector<16x32xf32> -> vector<16x32xf32>
    %384 = vector.broadcast %4 : vector<1x32xf32> to vector<16x32xf32>
    %385 = arith.addf %383, %384 : vector<16x32xf32>
    %386 = arith.addf %385, %208 : vector<16x32xf32>
    %cst_132 = arith.constant dense<0.000000e+00> : vector<16xf32>
    %387 = vector.multi_reduction <add>, %386, %cst_132 [1] : vector<16x32xf32> to vector<16xf32>
    %388 = vector.shape_cast %387 : vector<16xf32> to vector<16x1xf32>
    %cst_133 = arith.constant 3.200000e+01 : f32
    %389 = vector.broadcast %cst_133 : f32 to vector<16x1xf32>
    %390 = arith.divf %388, %389 : vector<16x1xf32>
    %391 = vector.broadcast %390 : vector<16x1xf32> to vector<16x32xf32>
    %392 = arith.subf %386, %391 : vector<16x32xf32>
    %393 = arith.mulf %392, %392 : vector<16x32xf32>
    %cst_134 = arith.constant dense<0.000000e+00> : vector<16xf32>
    %394 = vector.multi_reduction <add>, %393, %cst_134 [1] : vector<16x32xf32> to vector<16xf32>
    %395 = vector.shape_cast %394 : vector<16xf32> to vector<16x1xf32>
    %cst_135 = arith.constant 3.200000e+01 : f32
    %396 = vector.broadcast %cst_135 : f32 to vector<16x1xf32>
    %397 = arith.divf %395, %396 : vector<16x1xf32>
    %398 = vector.broadcast %390 : vector<16x1xf32> to vector<16x32xf32>
    %399 = arith.subf %386, %398 : vector<16x32xf32>
    %cst_136 = arith.constant 9.99999974E-6 : f32
    %400 = vector.broadcast %cst_136 : f32 to vector<16x1xf32>
    %401 = arith.addf %397, %400 : vector<16x1xf32>
    %402 = math.rsqrt %401 : vector<16x1xf32>
    %403 = vector.broadcast %402 : vector<16x1xf32> to vector<16x32xf32>
    %404 = arith.mulf %399, %403 : vector<16x32xf32>
    %405 = vector.broadcast %5 : vector<1x32xf32> to vector<16x32xf32>
    %406 = arith.mulf %404, %405 : vector<16x32xf32>
    %407 = vector.broadcast %6 : vector<1x32xf32> to vector<16x32xf32>
    %408 = arith.addf %406, %407 : vector<16x32xf32>
    %409 = arith.truncf %408 : vector<16x32xf32> to vector<16x32xbf16>
    %c0_137 = arith.constant 0 : index
    %c0_138 = arith.constant 0 : index
    %410 = vector.load %arg11[%c0_137, %c0_138] : memref<32x128xbf16, #tpu.memory_space<vmem>>, vector<32x128xbf16>
    %cst_139 = arith.constant dense<0.000000e+00> : vector<16x128xf32>
    %411 = tpu.matmul %409, %410, %cst_139 {dimension_numbers = #tpu.dot_dimension_numbers<[1], [0], [0], [1], [0, 0, 1, 1], [], []>} : vector<16x32xbf16>, vector<32x128xbf16>, vector<16x128xf32> -> vector<16x128xf32>
    %c0_140 = arith.constant 0 : index
    %c0_141 = arith.constant 0 : index
    %412 = vector.load %arg14[%c0_140, %c0_141] : memref<1x128xf32, #tpu.memory_space<vmem>>, vector<1x128xf32>
    %413 = vector.broadcast %412 : vector<1x128xf32> to vector<16x128xf32>
    %414 = arith.addf %411, %413 : vector<16x128xf32>
    %cst_142 = arith.constant 0.000000e+00 : f32
    %415 = vector.broadcast %cst_142 : f32 to vector<16x128xf32>
    %416 = arith.maximumf %414, %415 : vector<16x128xf32>
    %417 = arith.truncf %416 : vector<16x128xf32> to vector<16x128xbf16>
    %c0_143 = arith.constant 0 : index
    %c0_144 = arith.constant 0 : index
    %418 = vector.load %arg12[%c0_143, %c0_144] : memref<128x32xbf16, #tpu.memory_space<vmem>>, vector<128x32xbf16>
    %cst_145 = arith.constant dense<0.000000e+00> : vector<16x32xf32>
    %419 = tpu.matmul %417, %418, %cst_145 {dimension_numbers = #tpu.dot_dimension_numbers<[1], [0], [0], [1], [0, 0, 1, 1], [], []>} : vector<16x128xbf16>, vector<128x32xbf16>, vector<16x32xf32> -> vector<16x32xf32>
    %420 = vector.broadcast %7 : vector<1x32xf32> to vector<16x32xf32>
    %421 = arith.addf %419, %420 : vector<16x32xf32>
    %422 = arith.addf %421, %408 : vector<16x32xf32>
    %cst_146 = arith.constant dense<0.000000e+00> : vector<16xf32>
    %423 = vector.multi_reduction <add>, %422, %cst_146 [1] : vector<16x32xf32> to vector<16xf32>
    %424 = vector.shape_cast %423 : vector<16xf32> to vector<16x1xf32>
    %cst_147 = arith.constant 3.200000e+01 : f32
    %425 = vector.broadcast %cst_147 : f32 to vector<16x1xf32>
    %426 = arith.divf %424, %425 : vector<16x1xf32>
    %427 = vector.broadcast %426 : vector<16x1xf32> to vector<16x32xf32>
    %428 = arith.subf %422, %427 : vector<16x32xf32>
    %429 = arith.mulf %428, %428 : vector<16x32xf32>
    %cst_148 = arith.constant dense<0.000000e+00> : vector<16xf32>
    %430 = vector.multi_reduction <add>, %429, %cst_148 [1] : vector<16x32xf32> to vector<16xf32>
    %431 = vector.shape_cast %430 : vector<16xf32> to vector<16x1xf32>
    %cst_149 = arith.constant 3.200000e+01 : f32
    %432 = vector.broadcast %cst_149 : f32 to vector<16x1xf32>
    %433 = arith.divf %431, %432 : vector<16x1xf32>
    %434 = vector.broadcast %426 : vector<16x1xf32> to vector<16x32xf32>
    %435 = arith.subf %422, %434 : vector<16x32xf32>
    %cst_150 = arith.constant 9.99999974E-6 : f32
    %436 = vector.broadcast %cst_150 : f32 to vector<16x1xf32>
    %437 = arith.addf %433, %436 : vector<16x1xf32>
    %438 = math.rsqrt %437 : vector<16x1xf32>
    %439 = vector.broadcast %438 : vector<16x1xf32> to vector<16x32xf32>
    %440 = arith.mulf %435, %439 : vector<16x32xf32>
    %441 = vector.broadcast %8 : vector<1x32xf32> to vector<16x32xf32>
    %442 = arith.mulf %440, %441 : vector<16x32xf32>
    %443 = vector.broadcast %9 : vector<1x32xf32> to vector<16x32xf32>
    %444 = arith.addf %442, %443 : vector<16x32xf32>
    %c0_151 = arith.constant 0 : index
    %c0_152 = arith.constant 0 : index
    %445 = vector.load %arg15[%c0_151, %c0_152] : memref<16x32xf32, #tpu.memory_space<vmem>>, vector<16x32xf32>
    tpu.vector_store %arg15[%c0_151, %c0_152], %444 {strides = array<i32>} : memref<16x32xf32, #tpu.memory_space<vmem>>, vector<16x32xf32>,
    return
  }
}

</mosaic_0001>

<bundles_post_ra>
// kernel: tpu_custom_call.1
= control target key start
LH: loop header
LB: loop body
LE: loop exit
PB: predicated region body
PF: predicated region fallthrough
CT: control target
= control target key end

     0   :  { %20 = vsyncpa [#allocation4], 0  ;;  %s4226_s0 = inlined_call_operand.vmem [shape: f32[16,32], index: 0, kind: input, shape index: {}]   ;;  %s4227_s1 = inlined_call_operand.vmem [shape: f32[16,32], index: 1, kind: input, shape index: {}]   ;;  %s4228_s2 = inlined_call_operand.vmem [shape: f32[16,32], index: 2, kind: input, shape index: {}]   ;;  %s4229_s3 = inlined_call_operand.vmem [shape: bf16[32,32], index: 3, kind: input, shape index: {}]   ;;  %s4230_s4 = inlined_call_operand.vmem [shape: bf16[32,32], index: 4, kind: input, shape index: {}]   ;;  %s4231_s5 = inlined_call_operand.hbm [shape: bf16[32,32], index: 5, kind: input, shape index: {}]   ;;  %s4232_s6 = inlined_call_operand.hbm [shape: bf16[32,32], index: 6, kind: input, shape index: {}]   ;;  %s4233_s7 = inlined_call_operand.hbm [shape: bf16[32,32], index: 7, kind: input, shape index: {}]   ;;  %s4234_s8 = inlined_call_operand.hbm [shape: bf16[32,32], index: 8, kind: input, shape index: {}]   ;;  %s4235_s9 = inlined_call_operand.hbm [shape: bf16[32,32], index: 9, kind: input, shape index: {}]   ;;  %s4236_s10 = inlined_call_operand.hbm [shape: bf16[32,32], index: 10, kind: input, shape index: {}]   ;;  %s4237_s11 = inlined_call_operand.hbm [shape: bf16[32,128], index: 11, kind: input, shape index: {}]   ;;  %s4238_s12 = inlined_call_operand.vmem [shape: bf16[128,32], index: 12, kind: input, shape index: {}]   ;;  %s4239_s13 = inlined_call_operand.hbm [shape: f32[9,32], index: 13, kind: input, shape index: {}]   ;;  %s4240_s14 = inlined_call_operand.vmem [shape: f32[1,128], index: 14, kind: input, shape index: {}]   ;;  %s4241_s15 = inlined_call_operand.hbm [shape: f32[16,32], index: 15, kind: output, shape index: {}]  }
   0x1   :  { %21 = vsyncpa [#allocation7], 0 }
   0x2   :  { %22 = vsyncpa [#allocation10], 0 }
   0x3   :  { %23 = vsyncpa [#allocation13], 0 }
   0x4   :  { %24 = vsyncpa [#allocation16], 0 }
   0x5   :  { %25 = vsyncpa [#allocation5], 0  ;;  %s3583_s18 = smov [#allocation6]   ;;  %s3584_s20 = smov [#allocation9]  }
   0x6   :  { %s53_s19 = sshll.u32 %s3583_s18, 4  ;;  %s77_s21 = sshll.u32 %s3584_s20, 4  ;;  %s54_s19 = int_to_ptr.vmem [resolvable:$true] %s53_s19  ;;  %s78_s21 = int_to_ptr.vmem [resolvable:$true] %s77_s21 }
   0x7   :  { %s3399_s22 = scalar_lea.vmem %s54_s19, 256  ;;  %p3404_p1 = scmp.lt.s32.totalorder %s54_s19, %s54_s19 }
   0x8   :  { %p3400_p0 = scmp.ne.s32.totalorder %s54_s19, %s3399_s22  ;;  %p3405_p2 = scmp.lt.s32.totalorder %s3399_s22, %s3399_s22 }
   0xa   :  { %p3406_p3 = por %p3405_p2, %p3404_p1 }
   0xc   :  { %p3407_p4 = pnand %p3406_p3, %p3400_p0 }
   0xe   :  { %3410 = shalt.err (!%p3407_p4)
}
   0xf   :  { %s3585_s23 = smov 64   ;;  %s3586_s24 = smov 4  }
  0x10   :  { %59 = dma.hbm_to_vmem [thread:$0]  %s4232_s6, 256, %s54_s19, [#allocation7], %s3585_s23, %s3585_s23, %s3586_s24  }
  0x11   :  { %s3419_s27 = scalar_lea.vmem %s78_s21, 256  ;;  %p3424_p6 = scmp.lt.s32.totalorder %s78_s21, %s78_s21 }
  0x12   :  { %p3420_p5 = scmp.ne.s32.totalorder %s78_s21, %s3419_s27  ;;  %p3425_p7 = scmp.lt.s32.totalorder %s3419_s27, %s3419_s27 }
  0x14   :  { %p3426_p8 = por %p3425_p7, %p3424_p6 }
  0x16   :  { %p3427_p9 = pnand %p3426_p8, %p3420_p5 }
  0x18   :  { %3430 = shalt.err (!%p3427_p9)
}
  0x19   :  { %83 = dma.hbm_to_vmem [thread:$0]  %s4234_s8, 256, %s78_s21, [#allocation10], %s3585_s23, %s3585_s23, %s3586_s24  }
  0x1a   :  { %s3587_s30 = smov [#allocation12]   ;;  %s3588_s17 = smov [#allocation3]  }
  0x1b   :  { %s101_s16 = sshll.u32 %s3587_s30, 4  ;;  %s41_s18 = sshll.u32 %s3588_s17, 4  ;;  %s102_s16 = int_to_ptr.vmem [resolvable:$true] %s101_s16  ;;  %s42_s18 = int_to_ptr.vmem [resolvable:$true] %s41_s18 }
  0x1c   :  { %s3439_s6 = scalar_lea.vmem %s102_s16, 256  ;;  %p3444_p11 = scmp.lt.s32.totalorder %s102_s16, %s102_s16 }
  0x1d   :  { %p3440_p10 = scmp.ne.s32.totalorder %s102_s16, %s3439_s6  ;;  %p3445_p12 = scmp.lt.s32.totalorder %s3439_s6, %s3439_s6 }
  0x1f   :  { %p3446_p13 = por %p3445_p12, %p3444_p11 }
  0x21   :  { %p3447_p0 = pnand %p3446_p13, %p3440_p10 }
  0x23   :  { %3450 = shalt.err (!%p3447_p0)
}
  0x24   :  { %107 = dma.hbm_to_vmem [thread:$0]  %s4236_s10, 256, %s102_s16, [#allocation13], %s3585_s23, %s3585_s23, %s3586_s24  }
  0x25   :  { %s3459_s8 = scalar_lea.vmem %s42_s18, 256  ;;  %p3464_p2 = scmp.lt.s32.totalorder %s42_s18, %s42_s18 }
  0x26   :  { %p3460_p1 = scmp.ne.s32.totalorder %s42_s18, %s3459_s8  ;;  %p3465_p3 = scmp.lt.s32.totalorder %s3459_s8, %s3459_s8 }
  0x28   :  { %p3466_p4 = por %p3465_p3, %p3464_p2 }
  0x2a   :  { %p3467_p5 = pnand %p3466_p4, %p3460_p1 }
  0x2c   :  { %3470 = shalt.err (!%p3467_p5)
}
  0x2d   :  { %47 = dma.hbm_to_vmem [thread:$0]  %s4231_s5, 256, %s42_s18, [#allocation4], %s3585_s23, %s3585_s23, %s3586_s24  }
  0x2e   :  { %s3589_s25 = smov [#allocation8]   ;;  %s3590_s27 = smov [#allocation11]  }
  0x2f   :  { %s65_s26 = sshll.u32 %s3589_s25, 4  ;;  %s89_s28 = sshll.u32 %s3590_s27, 4  ;;  %s66_s26 = int_to_ptr.vmem [resolvable:$true] %s65_s26  ;;  %s90_s28 = int_to_ptr.vmem [resolvable:$true] %s89_s28 }
  0x30   :  { %s3479_s10 = scalar_lea.vmem %s66_s26, 256  ;;  %p3484_p7 = scmp.lt.s32.totalorder %s66_s26, %s66_s26 }
  0x31   :  { %p3480_p6 = scmp.ne.s32.totalorder %s66_s26, %s3479_s10  ;;  %p3485_p8 = scmp.lt.s32.totalorder %s3479_s10, %s3479_s10 }
  0x33   :  { %p3486_p9 = por %p3485_p8, %p3484_p7 }
  0x35   :  { %p3487_p10 = pnand %p3486_p9, %p3480_p6 }
  0x37   :  { %3490 = shalt.err (!%p3487_p10)
}
  0x38   :  { %71 = dma.hbm_to_vmem [thread:$0]  %s4233_s7, 256, %s66_s26, [#allocation7], %s3585_s23, %s3585_s23, %s3586_s24  }
  0x39   :  { %s3499_s5 = scalar_lea.vmem %s90_s28, 256  ;;  %p3504_p12 = scmp.lt.s32.totalorder %s90_s28, %s90_s28 }
  0x3a   :  { %p3500_p11 = scmp.ne.s32.totalorder %s90_s28, %s3499_s5  ;;  %p3505_p13 = scmp.lt.s32.totalorder %s3499_s5, %s3499_s5 }
  0x3c   :  { %p3506_p0 = por %p3505_p13, %p3504_p12 }
  0x3e   :  { %p3507_p1 = pnand %p3506_p0, %p3500_p11 }
  0x40   :  { %3510 = shalt.err (!%p3507_p1)
}
  0x41   :  { %95 = dma.hbm_to_vmem [thread:$0]  %s4235_s9, 256, %s90_s28, [#allocation10], %s3585_s23, %s3585_s23, %s3586_s24  }
  0x42   :  { %s3591_s18 = smov [#allocation14]   ;;  %s3592_s19 = smov [#allocation15]  }
  0x43   :  { %s113_s6 = sshll.u32 %s3591_s18, 4  ;;  %s127_s20 = sshll.u32 %s3592_s19, 4  ;;  %s114_s6 = int_to_ptr.vmem [resolvable:$true] %s113_s6  ;;  %s128_s20 = int_to_ptr.vmem [resolvable:$true] %s127_s20 }
  0x44   :  { %s3519_s7 = scalar_lea.vmem %s114_s6, 256  ;;  %p3524_p3 = scmp.lt.s32.totalorder %s114_s6, %s114_s6 }
  0x45   :  { %p3520_p2 = scmp.ne.s32.totalorder %s114_s6, %s3519_s7  ;;  %p3525_p4 = scmp.lt.s32.totalorder %s3519_s7, %s3519_s7 }
  0x47   :  { %p3526_p5 = por %p3525_p4, %p3524_p3 }
  0x49   :  { %p3527_p6 = pnand %p3526_p5, %p3520_p2 }
  0x4b   :  { %3530 = shalt.err (!%p3527_p6)
}
  0x4c   :  { %119 = dma.hbm_to_vmem [thread:$0]  %s4237_s11, 256, %s114_s6, [#allocation13], %s3585_s23, %s3585_s23, %s3586_s24  }
  0x4d   :  { %s3539_s9 = scalar_lea.vmem %s128_s20, 256  ;;  %p3544_p8 = scmp.lt.s32.totalorder %s128_s20, %s128_s20 }
  0x4e   :  { %p3540_p7 = scmp.ne.s32.totalorder %s128_s20, %s3539_s9  ;;  %p3545_p9 = scmp.lt.s32.totalorder %s3539_s9, %s3539_s9 }
  0x50   :  { %p3546_p10 = por %p3545_p9, %p3544_p8 }
  0x52   :  { %p3547_p11 = pnand %p3546_p10, %p3540_p7 }
  0x54   :  { %3550 = shalt.err (!%p3547_p11)
}
  0x55   :  { %s3593_s22 = smov 128   ;;  %s3594_s25 = smov 8  }
  0x56   :  { %133 = dma.hbm_to_vmem [thread:$0]  %s4239_s13, 256, %s128_s20, [#allocation16], %s3593_s22, %s3593_s22, %s3594_s25  }
  0x57   :  { %3571 = dma.done.wait [#allocation4], 256  }
  0x58   :  { %3572 = vsyncadd [#allocation4], 4294967040 }
  0x59   :  { %3573 = dma.done.wait [#allocation7], 512  }
  0x5a   :  { %3574 = vsyncadd [#allocation7], 4294966784 }
  0x5b   :  { %3575 = dma.done.wait [#allocation10], 512  }
  0x5c   :  { %3576 = vsyncadd [#allocation10], 4294966784 }
  0x5d   :  { %3577 = dma.done.wait [#allocation13], 512  }
  0x5e   :  { %3578 = vsyncadd [#allocation13], 4294966784 }
  0x5f   :  { %3579 = dma.done.wait [#allocation16], 256  }
  0x60   :  { %3580 = vsyncadd [#allocation16], 4294967040  ;;  %v3595_v0 = vmov 0.0   ;;  %vm3596_vm0 = vmmov 0   ;;  %v3288_v1 = vld [vmem:[%s4229_s3 + $0x8] sm:$0xff]   ;;  %v3289_v2 = vld [vmem:[%s4229_s3] sm:$0xff]  }
  0x61   :  { %2984 = vmatprep.subr.bf16.mxu0 %v3595_v0  ;;  %2988 = vmatprep.mubr.msk.bf16.mxu0 %vm3596_vm0, %v3595_v0  ;;  %v3746_v3 = vld [vmem:[%s4226_s0] sm:$0xff]  ;;  %v3751_v4 = vld [vmem:[%s4226_s0 + $0x8] sm:$0xff]  ;;  %vm182_vm1 = vcmask 261120   ;;  %vm344_vm2 = vcmask 64512   ;;  %s3597_s0 = smov 112   ;;  %s3599_s18 = smov 104  }
  0x62   :  { %3008 = vmatprep.subr.bf16.mxu1 %v3595_v0  ;;  %3010 = vmatprep.mubr.msk.bf16.mxu1 %vm3596_vm0, %v3595_v0  ;;  %v3290_v5 = vld [vmem:[%s4230_s4 + $0x8] sm:$0xff]   ;;  %v165_v6 = vpack.c.bf16 %v3751_v4, %v3746_v3  ;;  %v3291_v7 = vld [vmem:[%s4230_s4] sm:$0xff]   ;;  %s3598_s4 = smov 120   ;;  %v3292_v21 = vld [vmem:[#allocation3 + $0x8] sm:$0xff]   ;;  %vm406_vm3 = vcmask 1043456   ;;  %s3600_s6 = smov 16  }
  0x63   :  { %2985 = vmatpush3.bf16.msra.mxu0 %v3288_v1  ;;  %v3293_v22 = vld [vmem:[#allocation3] sm:$0xff]   ;;  %s3601_s19 = smov 24   ;;  %vm568_vm4 = vcmask 130112   ;;  %vm684_vm5 = vcmask 195712   ;;  %vm800_vm6 = vcmask 261312  }
  0x64   :  { %2986 = vmatprep.subr.bf16.mxu0 %v3595_v0 }
  0x67   :  { %2987 = vmatpush3.bf16.msra.mxu0 %v3289_v2 }
  0x68   :  { %2992 = vmatprep.subr.bf16.mxu0 %v3595_v0 }
  0x6a   :  { %2989 = vmatmul.mubr.msk.bf16.vlgmr.msra.gmra.mxu0 %vm182_vm1, %v165_v6 }
  0x6b   :  { %2993 = vmatpush3.bf16.msra.mxu0 %v3290_v5  ;;  %2996 = vmatprep.mubr.msk.bf16.mxu0 %vm3596_vm0, %v3595_v0 }
  0x6c   :  { %2994 = vmatprep.subr.bf16.mxu0 %v3595_v0 }
  0x6f   :  { %2995 = vmatpush3.bf16.msra.mxu0 %v3291_v7 }
  0x70   :  { %3000 = vmatprep.subr.bf16.mxu0 %v3595_v0 }
  0x72   :  { %2997 = vmatmul.mubr.msk.bf16.vlgmr.msra.gmra.mxu0 %vm182_vm1, %v165_v6 }
  0x73   :  { %3004 = vmatprep.mubr.msk.bf16.mxu0 %vm3596_vm0, %v3595_v0  ;;  %3001 = vmatpush3.bf16.msra.mxu0 %v3292_v21 }
  0x74   :  { %3002 = vmatprep.subr.bf16.mxu0 %v3595_v0 }
  0x77   :  { %3003 = vmatpush3.bf16.msra.mxu0 %v3293_v22 }
  0x78   :  { %3014 = vmatprep.subr.bf16.mxu0 %v3595_v0 }
  0x7a   :  { %3005 = vmatmul.mubr.msk.bf16.vlgmr.msra.gmra.mxu0 %vm182_vm1, %v165_v6 }
  0x7b   :  { %3016 = vmatprep.mubr.msk.bf16.mxu0 %vm3596_vm0, %v3595_v0 }
 0x12a   :  { %v220_v8 = vpop.f32.mrf.mxu0 }
 0x12b   :  { %v341_v17 = vpack.c.bf16 %v220_v8, %v220_v8 }
 0x12c   :  { %v2990_v9 = vpop.f32.mrf.mxu0 }
 0x12e   :  { %v223_v10 = vpop.f32.mrf.mxu0 }
 0x12f   :  { %v802_v19 = vpack.c.bf16 %v223_v10, %v223_v10 }
 0x130   :  { %v2991_v11 = vpop.f32.mrf.mxu0 }
 0x132   :  { %v277_v12 = vpop.f32.mrf.mxu0 }
 0x133   :  { %v342_v13 = vpack.c.bf16 %v277_v12, %v277_v12 }
 0x134   :  { %v2998_v14 = vpop.f32.mrf.mxu0 }
 0x135   :  { %572 = vrot.lane.b32.xlu1 %v342_v13, %s3597_s0  ;;  %455 = vrot.lane.b32.xlu0 %v342_v13, %s3598_s4  ;;  %v349_v15 = vsel %vm344_vm2, %v342_v13, 0 }
 0x136   :  { %v280_v16 = vpop.f32.mrf.mxu0  ;;  %3009 = vmatpush3.bf16.xpose.msra.mxu1 %v349_v15 }
 0x137   :  { %3020 = vmatprep.subr.bf16.mxu1 %v3595_v0  ;;  %v803_v20 = vpack.c.bf16 %v280_v16, %v280_v16 }
 0x138   :  { %v2999_v18 = vpop.f32.mrf.mxu0 }
 0x139   :  { %570 = vrot.lane.b32.xlu1 %v341_v17, %s3597_s0  ;;  %452 = vrot.lane.b32.xlu0 %v341_v17, %s3598_s4  ;;  %v809_v32 = vsel %vm344_vm2, %v803_v20, 0 }
 0x13a   :  { %v334_v22 = vpop.f32.mrf.mxu0 }
 0x13d   :  { %686 = vrot.lane.b32.xlu1 %v341_v17, %s3599_s18  ;;  %688 = vrot.lane.b32.xlu0 %v342_v13, %s3599_s18 }
 0x13e   :  { %3011 = vmatmul.mubr.msk.bf16.vlgmr.msra.gmra.mxu1 %vm344_vm2, %v341_v17 }
 0x13f   :  { %3022 = vmatprep.mubr.msk.bf16.mxu1 %vm3596_vm0, %v3595_v0 }
 0x141   :  { %911 = vrot.lane.b32.xlu1 %v802_v19, %s3598_s4  ;;  %914 = vrot.lane.b32.xlu0 %v803_v20, %s3598_s4 }
 0x145   :  { %1028 = vrot.lane.b32.xlu1 %v802_v19, %s3597_s0  ;;  %1030 = vrot.lane.b32.xlu0 %v803_v20, %s3597_s0 }
 0x149   :  { %1143 = vrot.lane.b32.xlu1 %v802_v19, %s3599_s18  ;;  %1145 = vrot.lane.b32.xlu0 %v803_v20, %s3599_s18 }
 0x1a7   :  { %v456_v23 = vpop.permute.xlu0 %455  ;;  %v573_v25 = vpop.permute.xlu1 %572 }
 0x1a8   :  { %v461_v24 = vsel %vm344_vm2, %v456_v23, 0  ;;  %v578_v27 = vsel %vm344_vm2, %v573_v25, 0  ;;  %v3006_v25 = vpop.f32.mrf.mxu0 }
 0x1a9   :  { %3021 = vmatpush3.bf16.xpose.msra.mxu1 %v461_v24 }
 0x1aa   :  { %3032 = vmatprep.subr.bf16.mxu1 %v3595_v0 }
 0x1ab   :  { %v453_v26 = vpop.permute.xlu0 %452  ;;  %v571_v29 = vpop.permute.xlu1 %570 }
 0x1af   :  { %v689_v28 = vpop.permute.xlu0 %688  ;;  %v687_v31 = vpop.permute.xlu1 %686 }
 0x1b0   :  { %3023 = vmatmul.mubr.msk.bf16.vlgmr.msra.gmra.mxu1 %vm344_vm2, %v453_v26  ;;  %v694_v30 = vsel %vm344_vm2, %v689_v28, 0  ;;  %v343_v28 = vpack.c.bf16 %v334_v22, %v334_v22 }
 0x1b1   :  { %3033 = vmatpush3.bf16.xpose.msra.mxu1 %v578_v27  ;;  %3034 = vmatprep.mubr.msk.bf16.mxu1 %vm3596_vm0, %v3595_v0  ;;  %v3846_v27 = vpop.f32.mrf.mxu0 }
 0x1b2   :  { %3044 = vmatprep.subr.bf16.mxu1 %v3595_v0 }
 0x1b3   :  { %v915_v33 = vpop.permute.xlu0 %914  ;;  %v912_v36 = vpop.permute.xlu1 %911 }
 0x1b4   :  { %v920_v34 = vsel %vm344_vm2, %v915_v33, 0 }
 0x1b7   :  { %v1031_v35 = vpop.permute.xlu0 %1030  ;;  %v1029_v39 = vpop.permute.xlu1 %1028 }
 0x1b8   :  { %3035 = vmatmul.mubr.msk.bf16.vlgmr.msra.gmra.mxu1 %vm344_vm2, %v571_v29  ;;  %v1036_v37 = vsel %vm344_vm2, %v1031_v35, 0 }
 0x1b9   :  { %3045 = vmatpush3.bf16.xpose.msra.mxu1 %v694_v30  ;;  %3046 = vmatprep.mubr.msk.bf16.mxu1 %vm3596_vm0, %v3595_v0  ;;  %v3007_v30 = vpop.f32.mrf.mxu0 }
 0x1ba   :  { %3056 = vmatprep.subr.bf16.mxu1 %v3595_v0 }
 0x1bb   :  { %v1146_v38 = vpop.permute.xlu0 %1145  ;;  %v1144_v41 = vpop.permute.xlu1 %1143 }
 0x1bc   :  { %v1151_v40 = vsel %vm344_vm2, %v1146_v38, 0 }
 0x1c0   :  { %3047 = vmatmul.mubr.msk.bf16.vlgmr.msra.gmra.mxu1 %vm344_vm2, %v687_v31  ;;  %v408_v31 = vsel %vm406_vm3, %v343_v28, 0 }
 0x1c1   :  { %3057 = vmatpush3.bf16.xpose.msra.mxu1 %v809_v32  ;;  %3058 = vmatprep.mubr.msk.bf16.mxu1 %vm3596_vm0, %v3595_v0 }
 0x1c2   :  { %3068 = vmatprep.subr.bf16.mxu1 %v3595_v0  ;;  %3015 = vmatpush3.bf16.msra.mxu0 %v408_v31 }
 0x1c3   :  { %3026 = vmatprep.subr.bf16.mxu0 %v3595_v0 }
 0x1c8   :  { %3059 = vmatmul.mubr.msk.bf16.vlgmr.msra.gmra.mxu1 %vm344_vm2, %v802_v19 }
 0x1c9   :  { %3069 = vmatpush3.bf16.xpose.msra.mxu1 %v920_v34  ;;  %3070 = vmatprep.mubr.msk.bf16.mxu1 %vm3596_vm0, %v3595_v0 }
 0x1ca   :  { %3080 = vmatprep.subr.bf16.mxu1 %v3595_v0 }
 0x1d0   :  { %3071 = vmatmul.mubr.msk.bf16.vlgmr.msra.gmra.mxu1 %vm344_vm2, %v912_v36 }
 0x1d1   :  { %3081 = vmatpush3.bf16.xpose.msra.mxu1 %v1036_v37  ;;  %3082 = vmatprep.mubr.msk.bf16.mxu1 %vm3596_vm0, %v3595_v0 }
 0x1d2   :  { %3092 = vmatprep.subr.bf16.mxu1 %v3595_v0 }
 0x1d8   :  { %3083 = vmatmul.mubr.msk.bf16.vlgmr.msra.gmra.mxu1 %vm344_vm2, %v1029_v39 }
 0x1d9   :  { %3093 = vmatpush3.bf16.xpose.msra.mxu1 %v1151_v40  ;;  %3094 = vmatprep.mubr.msk.bf16.mxu1 %vm3596_vm0, %v3595_v0 }
 0x1da   :  { %3104 = vmatprep.subr.bf16.mxu1 %v3595_v0 }
 0x1e0   :  { %3095 = vmatmul.mubr.msk.bf16.vlgmr.msra.gmra.mxu1 %vm344_vm2, %v1144_v41 }
 0x1e1   :  { %3108 = vmatprep.mubr.msk.bf16.mxu1 %vm3596_vm0, %v3595_v0 }
 0x1fe   :  { %v385_v42 = vpop.f32.mrf.mxu1 }
 0x1ff   :  { %v391_v43 = vsel %vm344_vm2, %v385_v42, -inf }
 0x200   :  { %v3012_v44 = vpop.f32.mrf.mxu1  ;;  %392 = vmax.xlane.f32.xlu0 %v391_v43 }
 0x202   :  { %v388_v45 = vpop.f32.mrf.mxu1 }
 0x204   :  { %v3013_v46 = vpop.f32.mrf.mxu1 }
 0x270   :  { %v497_v47 = vpop.f32.mrf.mxu1 }
 0x271   :  { %v503_v48 = vsel %vm344_vm2, %v497_v47, -inf }
 0x272   :  { %504 = vmax.xlane.f32.xlu1 %v503_v48  ;;  %v3024_v49 = vpop.f32.mrf.mxu1 }
 0x274   :  { %v500_v50 = vpop.f32.mrf.mxu1 }
 0x276   :  { %v3025_v51 = vpop.f32.mrf.mxu1 }
 0x278   :  { %v614_v52 = vpop.f32.mrf.mxu1 }
 0x279   :  { %v620_v53 = vsel %vm344_vm2, %v614_v52, -inf }
 0x27a   :  { %v3036_v54 = vpop.f32.mrf.mxu1  ;;  %621 = vmax.xlane.f32.xlu0 %v620_v53 }
 0x27c   :  { %v617_v55 = vpop.f32.mrf.mxu1 }
 0x27e   :  { %v3037_v56 = vpop.f32.mrf.mxu1 }
 0x280   :  { %v730_v57 = vpop.f32.mrf.mxu1 }
 0x281   :  { %v736_v58 = vsel %vm344_vm2, %v730_v57, -inf }
 0x282   :  { %v3048_v59 = vpop.f32.mrf.mxu1  ;;  %737 = vmax.xlane.f32.xlu0 %v736_v58 }
 0x284   :  { %v733_v60 = vpop.f32.mrf.mxu1 }
 0x286   :  { %v3049_v61 = vpop.f32.mrf.mxu1 }
 0x288   :  { %v3832_v62 = vpop.f32.mrf.mxu1 }
 0x289   :  { %v393_v63 = vpop.xlane.xlu0 %392  ;;  %v851_v1 = vsel %vm344_vm2, %v3832_v62, -inf }
 0x28a   :  { %v394_v2 = vsub.f32 %v385_v42, %v393_v63  ;;  %852 = vmax.xlane.f32.xlu1 %v851_v1  ;;  %v3060_v5 = vpop.f32.mrf.mxu1 }
 0x28c   :  { %v395_v6 = vmul.f32 1.442695, %v394_v2  ;;  %v848_v7 = vpop.f32.mrf.mxu1 }
 0x28e   :  { %3314 = vpow2.f32 %v395_v6  ;;  %v3061_v8 = vpop.f32.mrf.mxu1 }
 0x290   :  { %v3836_v9 = vpop.f32.mrf.mxu1 }
 0x291   :  { %v962_v10 = vsel %vm344_vm2, %v3836_v9, -inf }
 0x292   :  { %963 = vmax.xlane.f32.xlu0 %v962_v10  ;;  %v3072_v11 = vpop.f32.mrf.mxu1  ;;  %v804_v10 = vpack.c.bf16 %v3846_v27, %v3846_v27 }
 0x294   :  { %v959_v12 = vpop.f32.mrf.mxu1 }
 0x296   :  { %v3073_v13 = vpop.f32.mrf.mxu1 }
 0x298   :  { %v3840_v14 = vpop.f32.mrf.mxu1 }
 0x299   :  { %v1078_v15 = vsel %vm344_vm2, %v3840_v14, -inf }
 0x29a   :  { %1079 = vmax.xlane.f32.xlu1 %v1078_v15  ;;  %v3084_v16 = vpop.f32.mrf.mxu1 }
 0x29b   :  { %v3315_v17 = vpop.eup %3314 }
 0x29c   :  { %v1075_v18 = vpop.f32.mrf.mxu1  ;;  %v397_v19 = vsel %vm344_vm2, %v3315_v17, 0.0 }
 0x29e   :  { %398 = vadd.xlane.f32.xlu1 %v397_v19  ;;  %v3085_v20 = vpop.f32.mrf.mxu1 }
 0x2a0   :  { %v1187_v21 = vpop.f32.mrf.mxu1 }
 0x2a1   :  { %v1193_v23 = vsel %vm344_vm2, %v1187_v21, -inf }
 0x2a2   :  { %1194 = vmax.xlane.f32.xlu0 %v1193_v23  ;;  %v3096_v24 = vpop.f32.mrf.mxu1 }
 0x2a4   :  { %v1190_v26 = vpop.f32.mrf.mxu1 }
 0x2a6   :  { %v3097_v29 = vpop.f32.mrf.mxu1 }
 0x2a7   :  { %v867_v29 = vsel %vm406_vm3, %v804_v10, 0 }
 0x2fb   :  { %v505_v32 = vpop.xlane.xlu1 %504 }
 0x2fc   :  { %v506_v33 = vsub.f32 %v497_v47, %v505_v32 }
 0x2fe   :  { %v507_v34 = vmul.f32 1.442695, %v506_v33 }
 0x300   :  { %3316 = vpow2.f32 %v507_v34 }
 0x303   :  { %v622_v35 = vpop.xlane.xlu0 %621 }
 0x304   :  { %v623_v36 = vsub.f32 %v614_v52, %v622_v35 }
 0x306   :  { %v624_v37 = vmul.f32 1.442695, %v623_v36 }
 0x308   :  { %3318 = vpow2.f32 %v624_v37 }
 0x30b   :  { %v738_v38 = vpop.xlane.xlu0 %737 }
 0x30c   :  { %v739_v39 = vsub.f32 %v730_v57, %v738_v38 }
 0x30d   :  { %v3317_v40 = vpop.eup %3316 }
 0x30e   :  { %v740_v41 = vmul.f32 1.442695, %v739_v39  ;;  %v509_v42 = vsel %vm344_vm2, %v3317_v40, 0.0 }
 0x30f   :  { %510 = vadd.xlane.f32.xlu0 %v509_v42 }
 0x310   :  { %3320 = vpow2.f32 %v740_v41 }
 0x313   :  { %v853_v47 = vpop.xlane.xlu1 %852 }
 0x314   :  { %v854_v51 = vsub.f32 %v3832_v62, %v853_v47 }
 0x315   :  { %v3851_v43 = vpop.eup %3318 }
 0x316   :  { %v626_v44 = vsel %vm344_vm2, %v3851_v43, 0.0  ;;  %v855_v56 = vmul.f32 1.442695, %v854_v51 }
 0x317   :  { %627 = vadd.xlane.f32.xlu1 %v626_v44 }
 0x31b   :  { %v964_v52 = vpop.xlane.xlu0 %963 }
 0x31c   :  { %v965_v55 = vsub.f32 %v3836_v9, %v964_v52 }
 0x31d   :  { %v3855_v45 = vpop.eup %3320 }
 0x31e   :  { %v742_v46 = vsel %vm344_vm2, %v3855_v45, 0.0  ;;  %v966_v59 = vmul.f32 1.442695, %v965_v55 }
 0x31f   :  { %743 = vadd.xlane.f32.xlu0 %v742_v46 }
 0x323   :  { %v1080_v48 = vpop.xlane.xlu1 %1079 }
 0x324   :  { %v1081_v57 = vsub.f32 %v3840_v14, %v1080_v48 }
 0x326   :  { %v1082_v60 = vmul.f32 1.442695, %v1081_v57 }
 0x327   :  { %v399_v49 = vpop.xlane.xlu1 %398 }
 0x328   :  { %632 = vrot.lane.b32.xlu1 %v343_v28, %s3597_s0  ;;  %3322 = vrcp.f32 %v399_v49 }
 0x329   :  { %3324 = vpow2.f32 %v855_v56 }
 0x32a   :  { %3326 = vpow2.f32 %v966_v59 }
 0x32b   :  { %v1195_v58 = vpop.xlane.xlu0 %1194  ;;  %3328 = vpow2.f32 %v1082_v60 }
 0x32c   :  { %748 = vrot.lane.b32.xlu1 %v343_v28, %s3599_s18  ;;  %v1196_v61 = vsub.f32 %v1187_v21, %v1195_v58 }
 0x32e   :  { %v1197_v62 = vmul.f32 1.442695, %v1196_v61 }
 0x330   :  { %3330 = vpow2.f32 %v1197_v62 }
 0x335   :  { %516 = vrot.lane.b32.xlu0 %v343_v28, %s3598_s4  ;;  %v3323_v50 = vpop.eup %3322 }
 0x336   :  { %v401_v53 = vmul.f32 %v3323_v50, %v3315_v17  ;;  %v3325_v63 = vpop.eup %3324 }
 0x337   :  { %v3868_v1 = vpop.eup %3326  ;;  %v857_v2 = vsel %vm344_vm2, %v3325_v63, 0.0 }
 0x338   :  { %v402_v54 = vpack.c.bf16 %v401_v53, %v401_v53  ;;  %v3871_v5 = vpop.eup %3328  ;;  %v968_v6 = vsel %vm344_vm2, %v3868_v1, 0.0 }
 0x339   :  { %v1084_v7 = vsel %vm344_vm2, %v3871_v5, 0.0 }
 0x33a   :  { %3017 = vmatmul.mubr.msk.bf16.vlgmr.msra.gmra.mxu0 %vm344_vm2, %v402_v54 }
 0x33b   :  { %3028 = vmatprep.mubr.msk.bf16.mxu0 %vm3596_vm0, %v3595_v0 }
 0x33d   :  { %v3877_v8 = vpop.eup %3330 }
 0x33e   :  { %v1199_v9 = vsel %vm344_vm2, %v3877_v8, 0.0 }
 0x350   :  { %858 = vadd.xlane.f32.xlu1 %v857_v2 }
 0x354   :  { %969 = vadd.xlane.f32.xlu1 %v968_v6  ;;  %1085 = vadd.xlane.f32.xlu0 %v1084_v7 }
 0x358   :  { %1200 = vadd.xlane.f32.xlu1 %v1199_v9 }
 0x369   :  { %1090 = vrot.lane.b32.xlu1 %v804_v10, %s3597_s0 }
 0x36a   :  { %975 = vrot.lane.b32.xlu0 %v804_v10, %s3598_s4 }
 0x36e   :  { %1205 = vrot.lane.b32.xlu0 %v804_v10, %s3599_s18 }
 0x398   :  { %v511_v11 = vpop.xlane.xlu0 %510 }
 0x399   :  { %3332 = vrcp.f32 %v511_v11 }
 0x3a0   :  { %v628_v12 = vpop.xlane.xlu1 %627 }
 0x3a1   :  { %3334 = vrcp.f32 %v628_v12 }
 0x3a4   :  { %v633_v18 = vpop.permute.xlu1 %632 }
 0x3a5   :  { %v638_v21 = vsel %vm406_vm3, %v633_v18, 0 }
 0x3a6   :  { %v3333_v13 = vpop.eup %3332 }
 0x3a7   :  { %v513_v15 = vmul.f32 %v3333_v13, %v3317_v40 }
 0x3a8   :  { %v744_v14 = vpop.xlane.xlu0 %743  ;;  %v749_v23 = vpop.permute.xlu1 %748 }
 0x3a9   :  { %3336 = vrcp.f32 %v744_v14  ;;  %v514_v19 = vpack.c.bf16 %v513_v15, %v513_v15  ;;  %v754_v26 = vsel %vm406_vm3, %v749_v23, 0  ;;  %v3294_v14 = vld [vmem:[#allocation6 + $0x8] sm:$0xff]  }
 0x3aa   :  { %3105 = vmatpush3.bf16.msra.mxu1 %v3294_v14 }
 0x3ab   :  { %3106 = vmatprep.subr.bf16.mxu1 %v3595_v0 }
 0x3ac   :  { %v517_v16 = vpop.permute.xlu0 %516 }
 0x3ad   :  { %v522_v17 = vsel %vm406_vm3, %v517_v16, 0  ;;  %v3295_v16 = vld [vmem:[#allocation6] sm:$0xff]  }
 0x3ae   :  { %3027 = vmatpush3.bf16.msra.mxu0 %v522_v17  ;;  %v3335_v20 = vpop.eup %3334  ;;  %3107 = vmatpush3.bf16.msra.mxu1 %v3295_v16 }
 0x3af   :  { %3038 = vmatprep.subr.bf16.mxu0 %v3595_v0  ;;  %v630_v22 = vmul.f32 %v3335_v20, %v3851_v43  ;;  %3120 = vmatprep.subr.bf16.mxu1 %v3595_v0 }
 0x3b1   :  { %3029 = vmatmul.mubr.msk.bf16.vlgmr.msra.gmra.mxu0 %vm344_vm2, %v514_v19  ;;  %v631_v24 = vpack.c.bf16 %v630_v22, %v630_v22 }
 0x3b2   :  { %3039 = vmatpush3.bf16.msra.mxu0 %v638_v21  ;;  %3040 = vmatprep.mubr.msk.bf16.mxu0 %vm3596_vm0, %v3595_v0 }
 0x3b3   :  { %3050 = vmatprep.subr.bf16.mxu0 %v3595_v0 }
 0x3b6   :  { %v3337_v25 = vpop.eup %3336 }
 0x3b7   :  { %v746_v27 = vmul.f32 %v3337_v25, %v3855_v45 }
 0x3b9   :  { %3041 = vmatmul.mubr.msk.bf16.vlgmr.msra.gmra.mxu0 %vm344_vm2, %v631_v24  ;;  %v747_v28 = vpack.c.bf16 %v746_v27, %v746_v27 }
 0x3ba   :  { %3051 = vmatpush3.bf16.msra.mxu0 %v754_v26  ;;  %3052 = vmatprep.mubr.msk.bf16.mxu0 %vm3596_vm0, %v3595_v0 }
 0x3bb   :  { %3062 = vmatprep.subr.bf16.mxu0 %v3595_v0 }
 0x3c1   :  { %3053 = vmatmul.mubr.msk.bf16.vlgmr.msra.gmra.mxu0 %vm344_vm2, %v747_v28 }
 0x3c2   :  { %3063 = vmatpush3.bf16.msra.mxu0 %v867_v29  ;;  %3064 = vmatprep.mubr.msk.bf16.mxu0 %vm3596_vm0, %v3595_v0 }
 0x3c3   :  { %3074 = vmatprep.subr.bf16.mxu0 %v3595_v0 }
 0x3d9   :  { %v859_v30 = vpop.xlane.xlu1 %858 }
 0x3da   :  { %3338 = vrcp.f32 %v859_v30 }
 0x3dd   :  { %v970_v31 = vpop.xlane.xlu1 %969  ;;  %v1086_v32 = vpop.xlane.xlu0 %1085 }
 0x3de   :  { %3340 = vrcp.f32 %v970_v31 }
 0x3df   :  { %3342 = vrcp.f32 %v1086_v32 }
 0x3e1   :  { %v976_v35 = vpop.permute.xlu0 %975  ;;  %v1201_v38 = vpop.xlane.xlu1 %1200 }
 0x3e2   :  { %v981_v39 = vsel %vm406_vm3, %v976_v35, 0  ;;  %3344 = vrcp.f32 %v1201_v38 }
 0x3e5   :  { %v1091_v41 = vpop.permute.xlu1 %1090  ;;  %v1206_v46 = vpop.permute.xlu0 %1205 }
 0x3e6   :  { %v1096_v44 = vsel %vm406_vm3, %v1091_v41, 0  ;;  %v1211_v50 = vsel %vm406_vm3, %v1206_v46, 0 }
 0x3e7   :  { %v3339_v33 = vpop.eup %3338 }
 0x3e8   :  { %v861_v34 = vmul.f32 %v3339_v33, %v3325_v63 }
 0x3ea   :  { %v862_v36 = vpack.c.bf16 %v861_v34, %v861_v34  ;;  %v1265_v34 = vlaneseq }
 0x3eb   :  { %v3341_v37 = vpop.eup %3340 }
 0x3ec   :  { %3065 = vmatmul.mubr.msk.bf16.vlgmr.msra.gmra.mxu0 %vm344_vm2, %v862_v36  ;;  %v972_v40 = vmul.f32 %v3341_v37, %v3868_v1  ;;  %v3343_v43 = vpop.eup %3342  ;;  %v3945_v35 = vshrl.u32 %v1265_v34, 7  ;;  %v3948_v37 = vld [vmem:[#allocation15] sm:$0xff] }
 0x3ed   :  { %3075 = vmatpush3.bf16.msra.mxu0 %v981_v39  ;;  %3076 = vmatprep.mubr.msk.bf16.mxu0 %vm3596_vm0, %v3595_v0  ;;  %v1088_v45 = vmul.f32 %v3343_v43, %v3871_v5 }
 0x3ee   :  { %3086 = vmatprep.subr.bf16.mxu0 %v3595_v0  ;;  %v973_v42 = vpack.c.bf16 %v972_v40, %v972_v40  ;;  %v1267_v36 = vsub.s32 0, %v3945_v35 }
 0x3ef   :  { %v1089_v47 = vpack.c.bf16 %v1088_v45, %v1088_v45  ;;  %v3345_v48 = vpop.eup %3344 }
 0x3f0   :  { %v1203_v52 = vmul.f32 %v3345_v48, %v3877_v8  ;;  %v1268_v38 = vrot.slane %v3948_v37, %v1267_v36 }
 0x3f2   :  { %v1204_v55 = vpack.c.bf16 %v1203_v52, %v1203_v52 }
 0x3f4   :  { %3077 = vmatmul.mubr.msk.bf16.vlgmr.msra.gmra.mxu0 %vm344_vm2, %v973_v42 }
 0x3f5   :  { %3087 = vmatpush3.bf16.msra.mxu0 %v1096_v44  ;;  %3088 = vmatprep.mubr.msk.bf16.mxu0 %vm3596_vm0, %v3595_v0 }
 0x3f6   :  { %3098 = vmatprep.subr.bf16.mxu0 %v3595_v0 }
 0x3fa   :  { %v444_v49 = vpop.f32.mrf.mxu0 }
 0x3fb   :  { %450 = vst.msk [vmem:[#allocation2] sm:$0xff] %vm344_vm2, %v444_v49 }
 0x3fc   :  { %3089 = vmatmul.mubr.msk.bf16.vlgmr.msra.gmra.mxu0 %vm344_vm2, %v1089_v47  ;;  %v3018_v51 = vpop.f32.mrf.mxu0 }
 0x3fd   :  { %3099 = vmatpush3.bf16.msra.mxu0 %v1211_v50  ;;  %3100 = vmatprep.mubr.msk.bf16.mxu0 %vm3596_vm0, %v3595_v0 }
 0x3fe   :  { %3112 = vmatprep.subr.bf16.mxu0 %v3595_v0  ;;  %v447_v53 = vpop.f32.mrf.mxu0 }
 0x400   :  { %v3019_v54 = vpop.f32.mrf.mxu0 }
 0x404   :  { %3101 = vmatmul.mubr.msk.bf16.vlgmr.msra.gmra.mxu0 %vm344_vm2, %v1204_v55 }
 0x405   :  { %3116 = vmatprep.mubr.msk.bf16.mxu0 %vm3596_vm0, %v3595_v0 }
 0x471   :  { %v558_v56 = vpop.f32.mrf.mxu0 }
 0x472   :  { %565 = vrot.lane.b32.xlu0 %v558_v56, %s3594_s25 }
 0x473   :  { %v3030_v57 = vpop.f32.mrf.mxu0 }
 0x475   :  { %v561_v58 = vpop.f32.mrf.mxu0 }
 0x476   :  { %v3296_v58 = vld [vmem:[#allocation9 + $0x8] sm:$0xff]  }
 0x477   :  { %v3031_v59 = vpop.f32.mrf.mxu0 }
 0x478   :  { %v1368_v59 = vld [vmem:[%s4228_s2] sm:$0xff] }
 0x479   :  { %v674_v60 = vpop.f32.mrf.mxu0 }
 0x47a   :  { %681 = vrot.lane.b32.xlu0 %v674_v60, %s3600_s6  ;;  %v1369_v60 = vld [vmem:[%s4228_s2 + $0x8] sm:$0xff] }
 0x47b   :  { %v3042_v61 = vpop.f32.mrf.mxu0 }
 0x47c   :  { %v1431_v61 = vpack.c.bf16 %v1369_v60, %v1368_v59 }
 0x47d   :  { %v677_v62 = vpop.f32.mrf.mxu0 }
 0x47e   :  { %v3298_v62 = vld [vmem:[#allocation8 + $0x8] sm:$0xff]  }
 0x47f   :  { %v3043_v63 = vpop.f32.mrf.mxu0  ;;  %3113 = vmatpush3.bf16.msra.mxu0 %v3298_v62 }
 0x480   :  { %v3299_v63 = vld [vmem:[#allocation8] sm:$0xff]   ;;  %3114 = vmatprep.subr.bf16.mxu0 %v3595_v0 }
 0x481   :  { %v790_v1 = vpop.f32.mrf.mxu0 }
 0x482   :  { %797 = vrot.lane.b32.xlu0 %v790_v1, %s3601_s19 }
 0x483   :  { %v3054_v2 = vpop.f32.mrf.mxu0  ;;  %3115 = vmatpush3.bf16.msra.mxu0 %v3299_v63 }
 0x484   :  { %3128 = vmatprep.subr.bf16.mxu0 %v3595_v0 }
 0x485   :  { %v793_v5 = vpop.f32.mrf.mxu0 }
 0x487   :  { %v3055_v6 = vpop.f32.mrf.mxu0 }
 0x4ac   :  { %v903_v7 = vpop.f32.mrf.mxu0 }
 0x4ad   :  { %909 = vst.msk [vmem:[#allocation2 + $0x8] sm:$0xff] %vm344_vm2, %v903_v7 }
 0x4ae   :  { %v3066_v8 = vpop.f32.mrf.mxu0 }
 0x4b0   :  { %v906_v9 = vpop.f32.mrf.mxu0 }
 0x4b1   :  { %v1356_v9 = vsub.s32 1, %v3945_v35 }
 0x4b2   :  { %v3067_v10 = vpop.f32.mrf.mxu0 }
 0x4b4   :  { %v1017_v11 = vpop.f32.mrf.mxu0 }
 0x4b5   :  { %1024 = vrot.lane.b32.xlu1 %v1017_v11, %s3594_s25 }
 0x4b6   :  { %v3078_v12 = vpop.f32.mrf.mxu0 }
 0x4b7   :  { %v1357_v12 = vrot.slane %v3948_v37, %v1356_v9 }
 0x4b8   :  { %v1020_v13 = vpop.f32.mrf.mxu0 }
 0x4b9   :  { %v1362_v13 = vsub.s32 2, %v3945_v35 }
 0x4ba   :  { %v3079_v15 = vpop.f32.mrf.mxu0 }
 0x4bc   :  { %v1132_v17 = vpop.f32.mrf.mxu0 }
 0x4bd   :  { %1139 = vrot.lane.b32.xlu1 %v1132_v17, %s3600_s6  ;;  %v1363_v17 = vrot.slane %v3948_v37, %v1362_v13 }
 0x4be   :  { %v3090_v18 = vpop.f32.mrf.mxu0 }
 0x4c0   :  { %v1135_v19 = vpop.f32.mrf.mxu0 }
 0x4c2   :  { %v3091_v20 = vpop.f32.mrf.mxu0 }
 0x4c4   :  { %v1247_v21 = vpop.f32.mrf.mxu0 }
 0x4c5   :  { %1254 = vrot.lane.b32.xlu1 %v1247_v21, %s3601_s19 }
 0x4c6   :  { %v3102_v22 = vpop.f32.mrf.mxu0 }
 0x4c8   :  { %v1250_v23 = vpop.f32.mrf.mxu0 }
 0x4ca   :  { %v3103_v24 = vpop.f32.mrf.mxu0 }
 0x4e4   :  { %v566_v25 = vpop.permute.xlu0 %565 }
 0x4e5   :  { %569 = vst.msk [vmem:[#allocation2] sm:$0xff] %vm568_vm4, %v566_v25 }
 0x4ec   :  { %v682_v26 = vpop.permute.xlu0 %681 }
 0x4ed   :  { %685 = vst.msk [vmem:[#allocation2] sm:$0xff] %vm684_vm5, %v682_v26 }
 0x4f4   :  { %v798_v27 = vpop.permute.xlu0 %797 }
 0x4f5   :  { %801 = vst.msk [vmem:[#allocation2] sm:$0xff] %vm800_vm6, %v798_v27 }
 0x4fc   :  { %v1258_v31 = vld [vmem:[#allocation2] sm:$0xff] }
 0x527   :  { %v1025_v28 = vpop.permute.xlu1 %1024 }
 0x528   :  { %1027 = vst.msk [vmem:[#allocation2 + $0x8] sm:$0xff] %vm568_vm4, %v1025_v28 }
 0x52f   :  { %v1140_v29 = vpop.permute.xlu1 %1139 }
 0x530   :  { %1142 = vst.msk [vmem:[#allocation2 + $0x8] sm:$0xff] %vm684_vm5, %v1140_v29 }
 0x537   :  { %v1255_v30 = vpop.permute.xlu1 %1254 }
 0x538   :  { %1257 = vst.msk [vmem:[#allocation2 + $0x8] sm:$0xff] %vm800_vm6, %v1255_v30 }
 0x53f   :  { %v1259_v32 = vld [vmem:[#allocation2 + $0x8] sm:$0xff] }
 0x540   :  { %v1260_v33 = vpack.c.bf16 %v1259_v32, %v1258_v31 }
 0x542   :  { %3109 = vmatmul.mubr.msk.bf16.vlgmr.msra.gmra.mxu1 %vm182_vm1, %v1260_v33 }
 0x543   :  { %3124 = vmatprep.mubr.msk.bf16.mxu1 %vm3596_vm0, %v3595_v0  ;;  %3121 = vmatpush3.bf16.msra.mxu1 %v3296_v58 }
 0x544   :  { %3122 = vmatprep.subr.bf16.mxu1 %v3595_v0 }
 0x602   :  { %v1318_v39 = vpop.f32.mrf.mxu1 }
 0x603   :  { %v1319_v40 = vadd.f32 %v1318_v39, %v1268_v38  ;;  %v3300_v39 = vld [vmem:[#allocation11 + $0x8] sm:$0xff]  }
 0x604   :  { %v3110_v41 = vpop.f32.mrf.mxu1 }
 0x605   :  { %v1325_v42 = vadd.f32 %v1319_v40, %v3746_v3  ;;  %v3301_v40 = vld [vmem:[#allocation11] sm:$0xff]   ;;  %v1366_v41 = vld [vmem:[%s4227_s1] sm:$0xff] }
 0x606   :  { %v1321_v43 = vpop.f32.mrf.mxu1 }
 0x607   :  { %v1322_v44 = vadd.f32 %v1321_v43, %v1268_v38  ;;  %v1327_v45 = vsel %vm182_vm1, %v1325_v42, 0.0 }
 0x608   :  { %v3111_v46 = vpop.f32.mrf.mxu1  ;;  %1328 = vadd.xlane.f32.xlu0 %v1327_v45 }
 0x609   :  { %v1326_v47 = vadd.f32 %v1322_v44, %v3751_v4  ;;  %v3297_v4 = vld [vmem:[#allocation9] sm:$0xff]  }
 0x60a   :  { %3123 = vmatpush3.bf16.msra.mxu1 %v3297_v4 }
 0x60b   :  { %v1330_v48 = vsel %vm182_vm1, %v1326_v47, 0.0  ;;  %3136 = vmatprep.subr.bf16.mxu1 %v3595_v0 }
 0x60c   :  { %1331 = vadd.xlane.f32.xlu1 %v1330_v48 }
 0x60d   :  { %3125 = vmatmul.mubr.msk.bf16.vlgmr.msra.gmra.mxu1 %vm182_vm1, %v1431_v61 }
 0x60e   :  { %3138 = vmatprep.mubr.msk.bf16.mxu1 %vm3596_vm0, %v3595_v0 }
 0x691   :  { %v1329_v49 = vpop.xlane.xlu0 %1328 }
 0x692   :  { %v1334_v50 = vmul.f32 0.03125, %v1329_v49 }
 0x694   :  { %v1336_v51 = vsub.f32 %v1325_v42, %v1334_v50  ;;  %v1367_v42 = vld [vmem:[%s4227_s1 + $0x8] sm:$0xff] }
 0x695   :  { %v1332_v52 = vpop.xlane.xlu1 %1331  ;;  %v1492_v43 = vpack.c.bf16 %v1367_v42, %v1366_v41 }
 0x696   :  { %v1335_v53 = vmul.f32 0.03125, %v1332_v52  ;;  %v1338_v54 = vmul.f32 %v1336_v51, %v1336_v51 }
 0x698   :  { %v1337_v55 = vsub.f32 %v1326_v47, %v1335_v53  ;;  %v1340_v3 = vsel %vm182_vm1, %v1338_v54, 0.0 }
 0x699   :  { %1341 = vadd.xlane.f32.xlu0 %v1340_v3 }
 0x69a   :  { %v1339_v56 = vmul.f32 %v1337_v55, %v1337_v55 }
 0x69c   :  { %v1343_v57 = vsel %vm182_vm1, %v1339_v56, 0.0 }
 0x69d   :  { %1344 = vadd.xlane.f32.xlu0 %v1343_v57 }
 0x6cd   :  { %v1485_v22 = vpop.f32.mrf.mxu1 }
 0x6ce   :  { %v1554_v23 = vpack.c.bf16 %v1485_v22, %v1485_v22 }
 0x6cf   :  { %v3126_v24 = vpop.f32.mrf.mxu1 }
 0x6d0   :  { %1665 = vrot.lane.b32.xlu1 %v1554_v23, %s3598_s4  ;;  %v1560_v25 = vsel %vm344_vm2, %v1554_v23, 0 }
 0x6d1   :  { %v1488_v26 = vpop.f32.mrf.mxu1  ;;  %3137 = vmatpush3.bf16.xpose.msra.mxu1 %v1560_v25 }
 0x6d2   :  { %3148 = vmatprep.subr.bf16.mxu1 %v3595_v0  ;;  %v2010_v36 = vpack.c.bf16 %v1488_v26, %v1488_v26 }
 0x6d3   :  { %v3127_v27 = vpop.f32.mrf.mxu1 }
 0x6d4   :  { %1781 = vrot.lane.b32.xlu1 %v1554_v23, %s3597_s0 }
 0x722   :  { %v1342_v1 = vpop.xlane.xlu0 %1341 }
 0x723   :  { %v1346_v2 = vmul.f32 0.03125, %v1342_v1 }
 0x725   :  { %v1348_v5 = vadd.f32 1e-05, %v1346_v2 }
 0x726   :  { %v1345_v6 = vpop.xlane.xlu0 %1344 }
 0x727   :  { %3346 = vrsqrt.f32 %v1348_v5  ;;  %v1347_v7 = vmul.f32 0.03125, %v1345_v6 }
 0x729   :  { %v1349_v8 = vadd.f32 1e-05, %v1347_v7 }
 0x72b   :  { %3348 = vrsqrt.f32 %v1349_v8 }
 0x734   :  { %v3347_v10 = vpop.eup %3346 }
 0x735   :  { %v1352_v11 = vmul.f32 %v3347_v10, %v1336_v51  ;;  %v2016_v51 = vsel %vm344_vm2, %v2010_v36, 0 }
 0x737   :  { %v1358_v16 = vmul.f32 %v1357_v12, %v1352_v11 }
 0x738   :  { %v3349_v14 = vpop.eup %3348 }
 0x739   :  { %v1353_v15 = vmul.f32 %v3349_v14, %v1337_v55  ;;  %v3974_v19 = vadd.f32 %v1363_v17, %v1358_v16 }
 0x73b   :  { %v1359_v18 = vmul.f32 %v1357_v12, %v1353_v15 }
 0x73d   :  { %v3976_v20 = vadd.f32 %v1363_v17, %v1359_v18 }
 0x73f   :  { %v1370_v21 = vpack.c.bf16 %v3976_v20, %v3974_v19 }
 0x741   :  { %3117 = vmatmul.mubr.msk.bf16.vlgmr.msra.gmra.mxu0 %vm182_vm1, %v1370_v21 }
 0x742   :  { %3132 = vmatprep.mubr.msk.bf16.mxu0 %vm3596_vm0, %v3595_v0  ;;  %v1666_v30 = vpop.permute.xlu1 %1665  ;;  %3129 = vmatpush3.bf16.msra.mxu0 %v3300_v39 }
 0x743   :  { %v1671_v32 = vsel %vm344_vm2, %v1666_v30, 0  ;;  %3130 = vmatprep.subr.bf16.mxu0 %v3595_v0 }
 0x746   :  { %3131 = vmatpush3.bf16.msra.mxu0 %v3301_v40  ;;  %v1782_v44 = vpop.permute.xlu1 %1781 }
 0x747   :  { %3142 = vmatprep.subr.bf16.mxu0 %v3595_v0  ;;  %v1787_v46 = vsel %vm344_vm2, %v1782_v44, 0 }
 0x749   :  { %3133 = vmatmul.mubr.msk.bf16.vlgmr.msra.gmra.mxu0 %vm182_vm1, %v1492_v43 }
 0x74a   :  { %3144 = vmatprep.mubr.msk.bf16.mxu0 %vm3596_vm0, %v3595_v0 }
 0x801   :  { %v1424_v28 = vpop.f32.mrf.mxu0 }
 0x802   :  { %v1553_v29 = vpack.c.bf16 %v1424_v28, %v1424_v28 }
 0x803   :  { %v3118_v31 = vpop.f32.mrf.mxu0 }
 0x804   :  { %1779 = vrot.lane.b32.xlu1 %v1553_v29, %s3597_s0  ;;  %1662 = vrot.lane.b32.xlu0 %v1553_v29, %s3598_s4 }
 0x805   :  { %3139 = vmatmul.mubr.msk.bf16.vlgmr.msra.gmra.mxu1 %vm344_vm2, %v1553_v29  ;;  %v1427_v33 = vpop.f32.mrf.mxu0 }
 0x806   :  { %3149 = vmatpush3.bf16.xpose.msra.mxu1 %v1671_v32  ;;  %3150 = vmatprep.mubr.msk.bf16.mxu1 %vm3596_vm0, %v3595_v0  ;;  %v2009_v38 = vpack.c.bf16 %v1427_v33, %v1427_v33 }
 0x807   :  { %v3119_v34 = vpop.f32.mrf.mxu0  ;;  %3160 = vmatprep.subr.bf16.mxu1 %v3595_v0 }
 0x808   :  { %1894 = vrot.lane.b32.xlu1 %v1553_v29, %s3599_s18  ;;  %1896 = vrot.lane.b32.xlu0 %v1554_v23, %s3599_s18 }
 0x809   :  { %v1546_v43 = vpop.f32.mrf.mxu0 }
 0x80c   :  { %2121 = vrot.lane.b32.xlu0 %v2010_v36, %s3598_s4  ;;  %2118 = vrot.lane.b32.xlu1 %v2009_v38, %s3598_s4 }
 0x810   :  { %2237 = vrot.lane.b32.xlu0 %v2010_v36, %s3597_s0  ;;  %2235 = vrot.lane.b32.xlu1 %v2009_v38, %s3597_s0 }
 0x814   :  { %2352 = vrot.lane.b32.xlu0 %v2010_v36, %s3599_s18  ;;  %2350 = vrot.lane.b32.xlu1 %v2009_v38, %s3599_s18 }
 0x876   :  { %v1663_v45 = vpop.permute.xlu0 %1662  ;;  %v1780_v48 = vpop.permute.xlu1 %1779 }
 0x877   :  { %3151 = vmatmul.mubr.msk.bf16.vlgmr.msra.gmra.mxu1 %vm344_vm2, %v1663_v45 }
 0x878   :  { %3161 = vmatpush3.bf16.xpose.msra.mxu1 %v1787_v46  ;;  %3162 = vmatprep.mubr.msk.bf16.mxu1 %vm3596_vm0, %v3595_v0  ;;  %v3134_v46 = vpop.f32.mrf.mxu0 }
 0x879   :  { %3172 = vmatprep.subr.bf16.mxu1 %v3595_v0 }
 0x87a   :  { %v1897_v47 = vpop.permute.xlu0 %1896  ;;  %v1895_v50 = vpop.permute.xlu1 %1894 }
 0x87b   :  { %v1902_v49 = vsel %vm344_vm2, %v1897_v47, 0 }
 0x87e   :  { %v2122_v52 = vpop.permute.xlu0 %2121  ;;  %v2119_v55 = vpop.permute.xlu1 %2118 }
 0x87f   :  { %3163 = vmatmul.mubr.msk.bf16.vlgmr.msra.gmra.mxu1 %vm344_vm2, %v1780_v48  ;;  %v2127_v53 = vsel %vm344_vm2, %v2122_v52, 0  ;;  %v4064_v48 = vpop.f32.mrf.mxu0 }
 0x880   :  { %3173 = vmatpush3.bf16.xpose.msra.mxu1 %v1902_v49  ;;  %3174 = vmatprep.mubr.msk.bf16.mxu1 %vm3596_vm0, %v3595_v0  ;;  %v1555_v49 = vpack.c.bf16 %v1546_v43, %v1546_v43 }
 0x881   :  { %3184 = vmatprep.subr.bf16.mxu1 %v3595_v0 }
 0x882   :  { %v2238_v54 = vpop.permute.xlu0 %2237  ;;  %v2236_v57 = vpop.permute.xlu1 %2235  ;;  %v1618_v52 = vsel %vm406_vm3, %v1555_v49, 0 }
 0x883   :  { %v2243_v3 = vsel %vm344_vm2, %v2238_v54, 0  ;;  %3143 = vmatpush3.bf16.msra.mxu0 %v1618_v52 }
 0x884   :  { %3154 = vmatprep.subr.bf16.mxu0 %v3595_v0 }
 0x886   :  { %v2353_v56 = vpop.permute.xlu0 %2352  ;;  %v2351_v4 = vpop.permute.xlu1 %2350 }
 0x887   :  { %3175 = vmatmul.mubr.msk.bf16.vlgmr.msra.gmra.mxu1 %vm344_vm2, %v1895_v50  ;;  %v2358_v58 = vsel %vm344_vm2, %v2353_v56, 0 }
 0x888   :  { %3185 = vmatpush3.bf16.xpose.msra.mxu1 %v2016_v51  ;;  %3186 = vmatprep.mubr.msk.bf16.mxu1 %vm3596_vm0, %v3595_v0  ;;  %v3135_v51 = vpop.f32.mrf.mxu0 }
 0x889   :  { %3196 = vmatprep.subr.bf16.mxu1 %v3595_v0 }
 0x88f   :  { %3187 = vmatmul.mubr.msk.bf16.vlgmr.msra.gmra.mxu1 %vm344_vm2, %v2009_v38 }
 0x890   :  { %3197 = vmatpush3.bf16.xpose.msra.mxu1 %v2127_v53  ;;  %3198 = vmatprep.mubr.msk.bf16.mxu1 %vm3596_vm0, %v3595_v0 }
 0x891   :  { %3208 = vmatprep.subr.bf16.mxu1 %v3595_v0 }
 0x897   :  { %3199 = vmatmul.mubr.msk.bf16.vlgmr.msra.gmra.mxu1 %vm344_vm2, %v2119_v55 }
 0x898   :  { %3209 = vmatpush3.bf16.xpose.msra.mxu1 %v2243_v3  ;;  %3210 = vmatprep.mubr.msk.bf16.mxu1 %vm3596_vm0, %v3595_v0 }
 0x899   :  { %3220 = vmatprep.subr.bf16.mxu1 %v3595_v0 }
 0x89f   :  { %3211 = vmatmul.mubr.msk.bf16.vlgmr.msra.gmra.mxu1 %vm344_vm2, %v2236_v57 }
 0x8a0   :  { %3221 = vmatpush3.bf16.xpose.msra.mxu1 %v2358_v58  ;;  %3222 = vmatprep.mubr.msk.bf16.mxu1 %vm3596_vm0, %v3595_v0 }
 0x8a1   :  { %3232 = vmatprep.subr.bf16.mxu1 %v3595_v0 }
 0x8a7   :  { %3223 = vmatmul.mubr.msk.bf16.vlgmr.msra.gmra.mxu1 %vm344_vm2, %v2351_v4 }
 0x8a8   :  { %3236 = vmatprep.mubr.msk.bf16.mxu1 %vm3596_vm0, %v3595_v0 }
 0x8c5   :  { %v1596_v59 = vpop.f32.mrf.mxu1 }
 0x8c6   :  { %v1602_v60 = vsel %vm344_vm2, %v1596_v59, -inf }
 0x8c7   :  { %1603 = vmax.xlane.f32.xlu0 %v1602_v60  ;;  %v3140_v61 = vpop.f32.mrf.mxu1 }
 0x8c9   :  { %v1599_v62 = vpop.f32.mrf.mxu1 }
 0x8cb   :  { %v3141_v63 = vpop.f32.mrf.mxu1 }
 0x937   :  { %v1707_v1 = vpop.f32.mrf.mxu1 }
 0x938   :  { %v1713_v2 = vsel %vm344_vm2, %v1707_v1, -inf }
 0x939   :  { %v3152_v5 = vpop.f32.mrf.mxu1  ;;  %1714 = vmax.xlane.f32.xlu1 %v1713_v2 }
 0x93b   :  { %v1710_v6 = vpop.f32.mrf.mxu1 }
 0x93d   :  { %v3153_v7 = vpop.f32.mrf.mxu1 }
 0x93f   :  { %v1823_v8 = vpop.f32.mrf.mxu1 }
 0x940   :  { %v1829_v9 = vsel %vm344_vm2, %v1823_v8, -inf }
 0x941   :  { %1830 = vmax.xlane.f32.xlu0 %v1829_v9  ;;  %v3164_v10 = vpop.f32.mrf.mxu1 }
 0x943   :  { %v1826_v11 = vpop.f32.mrf.mxu1 }
 0x945   :  { %v3165_v12 = vpop.f32.mrf.mxu1 }
 0x947   :  { %v1938_v13 = vpop.f32.mrf.mxu1 }
 0x948   :  { %v1944_v14 = vsel %vm344_vm2, %v1938_v13, -inf }
 0x949   :  { %1945 = vmax.xlane.f32.xlu0 %v1944_v14  ;;  %v3176_v15 = vpop.f32.mrf.mxu1 }
 0x94b   :  { %v1941_v16 = vpop.f32.mrf.mxu1 }
 0x94d   :  { %v3177_v17 = vpop.f32.mrf.mxu1 }
 0x94f   :  { %v4050_v18 = vpop.f32.mrf.mxu1 }
 0x950   :  { %v1604_v21 = vpop.xlane.xlu0 %1603  ;;  %v2058_v22 = vsel %vm344_vm2, %v4050_v18, -inf }
 0x951   :  { %v1605_v23 = vsub.f32 %v1596_v59, %v1604_v21  ;;  %2059 = vmax.xlane.f32.xlu1 %v2058_v22  ;;  %v3188_v24 = vpop.f32.mrf.mxu1 }
 0x953   :  { %v1606_v25 = vmul.f32 1.442695, %v1605_v23  ;;  %v2055_v26 = vpop.f32.mrf.mxu1 }
 0x955   :  { %3350 = vpow2.f32 %v1606_v25  ;;  %v3189_v27 = vpop.f32.mrf.mxu1 }
 0x957   :  { %v4054_v28 = vpop.f32.mrf.mxu1 }
 0x958   :  { %v2169_v29 = vsel %vm344_vm2, %v4054_v28, -inf }
 0x959   :  { %2170 = vmax.xlane.f32.xlu0 %v2169_v29  ;;  %v3200_v30 = vpop.f32.mrf.mxu1 }
 0x95b   :  { %v2166_v31 = vpop.f32.mrf.mxu1 }
 0x95c   :  { %v2011_v31 = vpack.c.bf16 %v4064_v48, %v4064_v48 }
 0x95d   :  { %v3201_v32 = vpop.f32.mrf.mxu1 }
 0x95e   :  { %v2074_v52 = vsel %vm406_vm3, %v2011_v31, 0 }
 0x95f   :  { %v4058_v33 = vpop.f32.mrf.mxu1 }
 0x960   :  { %v2285_v34 = vsel %vm344_vm2, %v4058_v33, -inf }
 0x961   :  { %2286 = vmax.xlane.f32.xlu1 %v2285_v34  ;;  %v3212_v36 = vpop.f32.mrf.mxu1 }
 0x962   :  { %v3351_v38 = vpop.eup %3350 }
 0x963   :  { %v2282_v39 = vpop.f32.mrf.mxu1  ;;  %v1608_v40 = vsel %vm344_vm2, %v3351_v38, 0.0 }
 0x965   :  { %1609 = vadd.xlane.f32.xlu1 %v1608_v40  ;;  %v3213_v41 = vpop.f32.mrf.mxu1 }
 0x967   :  { %v2394_v42 = vpop.f32.mrf.mxu1 }
 0x968   :  { %v2400_v44 = vsel %vm344_vm2, %v2394_v42, -inf }
 0x969   :  { %2401 = vmax.xlane.f32.xlu0 %v2400_v44  ;;  %v3224_v45 = vpop.f32.mrf.mxu1 }
 0x96b   :  { %v2397_v47 = vpop.f32.mrf.mxu1 }
 0x96d   :  { %v3225_v50 = vpop.f32.mrf.mxu1 }
 0x9c2   :  { %v1715_v53 = vpop.xlane.xlu1 %1714 }
 0x9c3   :  { %v1716_v54 = vsub.f32 %v1707_v1, %v1715_v53 }
 0x9c5   :  { %v1717_v55 = vmul.f32 1.442695, %v1716_v54 }
 0x9c7   :  { %3352 = vpow2.f32 %v1717_v55 }
 0x9ca   :  { %v1831_v3 = vpop.xlane.xlu0 %1830 }
 0x9cb   :  { %v1832_v56 = vsub.f32 %v1823_v8, %v1831_v3 }
 0x9cd   :  { %v1833_v57 = vmul.f32 1.442695, %v1832_v56 }
 0x9cf   :  { %3354 = vpow2.f32 %v1833_v57 }
 0x9d2   :  { %v1946_v58 = vpop.xlane.xlu0 %1945 }
 0x9d3   :  { %v1947_v4 = vsub.f32 %v1938_v13, %v1946_v58 }
 0x9d4   :  { %v3353_v59 = vpop.eup %3352 }
 0x9d5   :  { %v1948_v60 = vmul.f32 1.442695, %v1947_v4  ;;  %v1719_v61 = vsel %vm344_vm2, %v3353_v59, 0.0 }
 0x9d6   :  { %1720 = vadd.xlane.f32.xlu0 %v1719_v61 }
 0x9d7   :  { %3356 = vpow2.f32 %v1948_v60 }
 0x9da   :  { %v2060_v5 = vpop.xlane.xlu1 %2059 }
 0x9db   :  { %v2061_v9 = vsub.f32 %v4050_v18, %v2060_v5 }
 0x9dc   :  { %v4069_v62 = vpop.eup %3354 }
 0x9dd   :  { %v1835_v63 = vsel %vm344_vm2, %v4069_v62, 0.0  ;;  %v2062_v14 = vmul.f32 1.442695, %v2061_v9 }
 0x9de   :  { %1836 = vadd.xlane.f32.xlu1 %v1835_v63 }
 0x9e2   :  { %v2171_v10 = vpop.xlane.xlu0 %2170 }
 0x9e3   :  { %v2172_v13 = vsub.f32 %v4054_v28, %v2171_v10 }
 0x9e4   :  { %v4073_v1 = vpop.eup %3356 }
 0x9e5   :  { %v1950_v2 = vsel %vm344_vm2, %v4073_v1, 0.0  ;;  %v2173_v17 = vmul.f32 1.442695, %v2172_v13 }
 0x9e6   :  { %1951 = vadd.xlane.f32.xlu0 %v1950_v2 }
 0x9ea   :  { %v2287_v6 = vpop.xlane.xlu1 %2286 }
 0x9eb   :  { %v2288_v15 = vsub.f32 %v4058_v33, %v2287_v6 }
 0x9ed   :  { %v2289_v21 = vmul.f32 1.442695, %v2288_v15 }
 0x9ee   :  { %v1610_v7 = vpop.xlane.xlu1 %1609 }
 0x9ef   :  { %1841 = vrot.lane.b32.xlu1 %v1555_v49, %s3597_s0  ;;  %3358 = vrcp.f32 %v1610_v7 }
 0x9f0   :  { %3360 = vpow2.f32 %v2062_v14 }
 0x9f1   :  { %3362 = vpow2.f32 %v2173_v17 }
 0x9f2   :  { %v2402_v16 = vpop.xlane.xlu0 %2401  ;;  %3364 = vpow2.f32 %v2289_v21 }
 0x9f3   :  { %1956 = vrot.lane.b32.xlu1 %v1555_v49, %s3599_s18  ;;  %v2403_v22 = vsub.f32 %v2394_v42, %v2402_v16 }
 0x9f5   :  { %v2404_v18 = vmul.f32 1.442695, %v2403_v22 }
 0x9f7   :  { %3366 = vpow2.f32 %v2404_v18 }
 0x9fc   :  { %1726 = vrot.lane.b32.xlu0 %v1555_v49, %s3598_s4  ;;  %v3359_v8 = vpop.eup %3358 }
 0x9fd   :  { %v1612_v11 = vmul.f32 %v3359_v8, %v3351_v38  ;;  %v3361_v23 = vpop.eup %3360 }
 0x9fe   :  { %v4086_v24 = vpop.eup %3362  ;;  %v2064_v25 = vsel %vm344_vm2, %v3361_v23, 0.0 }
 0x9ff   :  { %v1613_v12 = vpack.c.bf16 %v1612_v11, %v1612_v11  ;;  %v4089_v26 = vpop.eup %3364  ;;  %v2175_v27 = vsel %vm344_vm2, %v4086_v24, 0.0 }
 0xa00   :  { %v2291_v28 = vsel %vm344_vm2, %v4089_v26, 0.0 }
 0xa01   :  { %3145 = vmatmul.mubr.msk.bf16.vlgmr.msra.gmra.mxu0 %vm344_vm2, %v1613_v12 }
 0xa02   :  { %3156 = vmatprep.mubr.msk.bf16.mxu0 %vm3596_vm0, %v3595_v0 }
 0xa04   :  { %v4095_v29 = vpop.eup %3366 }
 0xa05   :  { %v2406_v30 = vsel %vm344_vm2, %v4095_v29, 0.0 }
 0xa17   :  { %2065 = vadd.xlane.f32.xlu1 %v2064_v25 }
 0xa1b   :  { %2176 = vadd.xlane.f32.xlu1 %v2175_v27  ;;  %2292 = vadd.xlane.f32.xlu0 %v2291_v28 }
 0xa1f   :  { %2407 = vadd.xlane.f32.xlu1 %v2406_v30 }
 0xa30   :  { %2297 = vrot.lane.b32.xlu1 %v2011_v31, %s3597_s0 }
 0xa31   :  { %2182 = vrot.lane.b32.xlu0 %v2011_v31, %s3598_s4 }
 0xa35   :  { %2412 = vrot.lane.b32.xlu0 %v2011_v31, %s3599_s18 }
 0xa5f   :  { %v1721_v32 = vpop.xlane.xlu0 %1720 }
 0xa60   :  { %3368 = vrcp.f32 %v1721_v32 }
 0xa67   :  { %v1837_v33 = vpop.xlane.xlu1 %1836 }
 0xa68   :  { %3370 = vrcp.f32 %v1837_v33 }
 0xa6b   :  { %v1842_v41 = vpop.permute.xlu1 %1841 }
 0xa6c   :  { %v1847_v44 = vsel %vm406_vm3, %v1842_v41, 0  ;;  %v3303_v41 = vld [vmem:[#allocation12] sm:$0xff]  }
 0xa6d   :  { %v3369_v34 = vpop.eup %3368 }
 0xa6e   :  { %v1723_v38 = vmul.f32 %v3369_v34, %v3353_v59 }
 0xa6f   :  { %v1952_v36 = vpop.xlane.xlu0 %1951  ;;  %v1957_v46 = vpop.permute.xlu1 %1956 }
 0xa70   :  { %3372 = vrcp.f32 %v1952_v36  ;;  %v1724_v42 = vpack.c.bf16 %v1723_v38, %v1723_v38  ;;  %v1962_v49 = vsel %vm406_vm3, %v1957_v46, 0 }
 0xa73   :  { %v1727_v39 = vpop.permute.xlu0 %1726 }
 0xa74   :  { %v1732_v40 = vsel %vm406_vm3, %v1727_v39, 0  ;;  %v3302_v39 = vld [vmem:[#allocation12 + $0x8] sm:$0xff]  }
 0xa75   :  { %3155 = vmatpush3.bf16.msra.mxu0 %v1732_v40  ;;  %v3371_v43 = vpop.eup %3370  ;;  %3233 = vmatpush3.bf16.msra.mxu1 %v3302_v39 }
 0xa76   :  { %3166 = vmatprep.subr.bf16.mxu0 %v3595_v0  ;;  %v1839_v45 = vmul.f32 %v3371_v43, %v4069_v62  ;;  %3234 = vmatprep.subr.bf16.mxu1 %v3595_v0 }
 0xa78   :  { %3157 = vmatmul.mubr.msk.bf16.vlgmr.msra.gmra.mxu0 %vm344_vm2, %v1724_v42  ;;  %v1840_v47 = vpack.c.bf16 %v1839_v45, %v1839_v45 }
 0xa79   :  { %3167 = vmatpush3.bf16.msra.mxu0 %v1847_v44  ;;  %3168 = vmatprep.mubr.msk.bf16.mxu0 %vm3596_vm0, %v3595_v0 }
 0xa7a   :  { %3178 = vmatprep.subr.bf16.mxu0 %v3595_v0  ;;  %3235 = vmatpush3.bf16.msra.mxu1 %v3303_v41 }
 0xa7b   :  { %3248 = vmatprep.subr.bf16.mxu1 %v3595_v0 }
 0xa7d   :  { %v3373_v48 = vpop.eup %3372 }
 0xa7e   :  { %v1954_v50 = vmul.f32 %v3373_v48, %v4073_v1 }
 0xa80   :  { %3169 = vmatmul.mubr.msk.bf16.vlgmr.msra.gmra.mxu0 %vm344_vm2, %v1840_v47  ;;  %v1955_v51 = vpack.c.bf16 %v1954_v50, %v1954_v50 }
 0xa81   :  { %3179 = vmatpush3.bf16.msra.mxu0 %v1962_v49  ;;  %3180 = vmatprep.mubr.msk.bf16.mxu0 %vm3596_vm0, %v3595_v0 }
 0xa82   :  { %3190 = vmatprep.subr.bf16.mxu0 %v3595_v0 }
 0xa88   :  { %3181 = vmatmul.mubr.msk.bf16.vlgmr.msra.gmra.mxu0 %vm344_vm2, %v1955_v51 }
 0xa89   :  { %3191 = vmatpush3.bf16.msra.mxu0 %v2074_v52  ;;  %3192 = vmatprep.mubr.msk.bf16.mxu0 %vm3596_vm0, %v3595_v0 }
 0xa8a   :  { %3202 = vmatprep.subr.bf16.mxu0 %v3595_v0 }
 0xaa0   :  { %v2066_v53 = vpop.xlane.xlu1 %2065 }
 0xaa1   :  { %3374 = vrcp.f32 %v2066_v53 }
 0xaa4   :  { %v2177_v54 = vpop.xlane.xlu1 %2176  ;;  %v2293_v55 = vpop.xlane.xlu0 %2292 }
 0xaa5   :  { %3376 = vrcp.f32 %v2177_v54 }
 0xaa6   :  { %3378 = vrcp.f32 %v2293_v55 }
 0xaa8   :  { %v2183_v57 = vpop.permute.xlu0 %2182  ;;  %v2408_v59 = vpop.xlane.xlu1 %2407 }
 0xaa9   :  { %v2188_v60 = vsel %vm406_vm3, %v2183_v57, 0  ;;  %3380 = vrcp.f32 %v2408_v59 }
 0xaac   :  { %v2298_v62 = vpop.permute.xlu1 %2297  ;;  %v2413_v6 = vpop.permute.xlu0 %2412 }
 0xaad   :  { %v2303_v2 = vsel %vm406_vm3, %v2298_v62, 0  ;;  %v2418_v10 = vsel %vm406_vm3, %v2413_v6, 0 }
 0xaae   :  { %v3375_v3 = vpop.eup %3374 }
 0xaaf   :  { %v2068_v56 = vmul.f32 %v3375_v3, %v3361_v23 }
 0xab1   :  { %v2069_v58 = vpack.c.bf16 %v2068_v56, %v2068_v56 }
 0xab2   :  { %v3377_v4 = vpop.eup %3376 }
 0xab3   :  { %3193 = vmatmul.mubr.msk.bf16.vlgmr.msra.gmra.mxu0 %vm344_vm2, %v2069_v58  ;;  %v2179_v61 = vmul.f32 %v3377_v4, %v4086_v24  ;;  %v3379_v1 = vpop.eup %3378  ;;  %v2474_v58 = vsub.s32 3, %v3945_v35 }
 0xab4   :  { %3203 = vmatpush3.bf16.msra.mxu0 %v2188_v60  ;;  %3204 = vmatprep.mubr.msk.bf16.mxu0 %vm3596_vm0, %v3595_v0  ;;  %v2295_v5 = vmul.f32 %v3379_v1, %v4089_v26 }
 0xab5   :  { %3214 = vmatprep.subr.bf16.mxu0 %v3595_v0  ;;  %v2180_v63 = vpack.c.bf16 %v2179_v61, %v2179_v61  ;;  %v2475_v4 = vrot.slane %v3948_v37, %v2474_v58 }
 0xab6   :  { %v2296_v7 = vpack.c.bf16 %v2295_v5, %v2295_v5  ;;  %v3381_v8 = vpop.eup %3380 }
 0xab7   :  { %v2410_v12 = vmul.f32 %v3381_v8, %v4095_v29 }
 0xab9   :  { %v2411_v15 = vpack.c.bf16 %v2410_v12, %v2410_v12 }
 0xabb   :  { %3205 = vmatmul.mubr.msk.bf16.vlgmr.msra.gmra.mxu0 %vm344_vm2, %v2180_v63 }
 0xabc   :  { %3215 = vmatpush3.bf16.msra.mxu0 %v2303_v2  ;;  %3216 = vmatprep.mubr.msk.bf16.mxu0 %vm3596_vm0, %v3595_v0 }
 0xabd   :  { %3226 = vmatprep.subr.bf16.mxu0 %v3595_v0 }
 0xac1   :  { %v1654_v9 = vpop.f32.mrf.mxu0 }
 0xac2   :  { %1660 = vst.msk [vmem:[#allocation2] sm:$0xff] %vm344_vm2, %v1654_v9 }
 0xac3   :  { %3217 = vmatmul.mubr.msk.bf16.vlgmr.msra.gmra.mxu0 %vm344_vm2, %v2296_v7  ;;  %v3146_v11 = vpop.f32.mrf.mxu0 }
 0xac4   :  { %3227 = vmatpush3.bf16.msra.mxu0 %v2418_v10  ;;  %3228 = vmatprep.mubr.msk.bf16.mxu0 %vm3596_vm0, %v3595_v0 }
 0xac5   :  { %3240 = vmatprep.subr.bf16.mxu0 %v3595_v0  ;;  %v1657_v13 = vpop.f32.mrf.mxu0 }
 0xac7   :  { %v3147_v14 = vpop.f32.mrf.mxu0 }
 0xacb   :  { %3229 = vmatmul.mubr.msk.bf16.vlgmr.msra.gmra.mxu0 %vm344_vm2, %v2411_v15 }
 0xacc   :  { %3244 = vmatprep.mubr.msk.bf16.mxu0 %vm3596_vm0, %v3595_v0 }
 0xb38   :  { %v1768_v16 = vpop.f32.mrf.mxu0 }
 0xb39   :  { %1775 = vrot.lane.b32.xlu0 %v1768_v16, %s3594_s25 }
 0xb3a   :  { %v3158_v17 = vpop.f32.mrf.mxu0 }
 0xb3b   :  { %v3304_v17 = vld [vmem:[#allocation14 + $0x8] sm:$0xff]  }
 0xb3c   :  { %v1771_v21 = vpop.f32.mrf.mxu0  ;;  %3241 = vmatpush3.bf16.msra.mxu0 %v3304_v17 }
 0xb3d   :  { %3242 = vmatprep.subr.bf16.mxu0 %v3595_v0  ;;  %v3306_v21 = vld [vmem:[%s4238_s12 + $0x38] sm:$0xff]  }
 0xb3e   :  { %v3159_v22 = vpop.f32.mrf.mxu0 }
 0xb3f   :  { %v3307_v22 = vld [vmem:[%s4238_s12 + $0x30] sm:$0xff]  }
 0xb40   :  { %v1883_v18 = vpop.f32.mrf.mxu0 }
 0xb41   :  { %1890 = vrot.lane.b32.xlu0 %v1883_v18, %s3600_s6  ;;  %v3308_v18 = vld [vmem:[%s4238_s12 + $0x28] sm:$0xff]  }
 0xb42   :  { %v3170_v23 = vpop.f32.mrf.mxu0 }
 0xb43   :  { %v3309_v23 = vld [vmem:[%s4238_s12 + $0x20] sm:$0xff]  }
 0xb44   :  { %v1886_v24 = vpop.f32.mrf.mxu0 }
 0xb45   :  { %v3310_v24 = vld [vmem:[%s4238_s12 + $0x18] sm:$0xff]  }
 0xb46   :  { %v3171_v25 = vpop.f32.mrf.mxu0 }
 0xb48   :  { %v1998_v26 = vpop.f32.mrf.mxu0 }
 0xb49   :  { %2005 = vrot.lane.b32.xlu0 %v1998_v26, %s3601_s19 }
 0xb4a   :  { %v3182_v27 = vpop.f32.mrf.mxu0 }
 0xb4c   :  { %v2001_v28 = vpop.f32.mrf.mxu0 }
 0xb4e   :  { %v3183_v29 = vpop.f32.mrf.mxu0 }
 0xb73   :  { %v2110_v30 = vpop.f32.mrf.mxu0 }
 0xb74   :  { %2116 = vst.msk [vmem:[#allocation2 + $0x8] sm:$0xff] %vm344_vm2, %v2110_v30 }
 0xb75   :  { %v3194_v31 = vpop.f32.mrf.mxu0 }
 0xb76   :  { %v2562_v31 = vsub.s32 4, %v3945_v35 }
 0xb77   :  { %v2113_v32 = vpop.f32.mrf.mxu0 }
 0xb79   :  { %v3195_v33 = vpop.f32.mrf.mxu0 }
 0xb7b   :  { %v2224_v34 = vpop.f32.mrf.mxu0 }
 0xb7c   :  { %2231 = vrot.lane.b32.xlu1 %v2224_v34, %s3594_s25  ;;  %v2563_v34 = vrot.slane %v3948_v37, %v2562_v31 }
 0xb7d   :  { %v3206_v36 = vpop.f32.mrf.mxu0 }
 0xb7e   :  { %v2568_v36 = vsub.s32 5, %v3945_v35 }
 0xb7f   :  { %v2227_v38 = vpop.f32.mrf.mxu0 }
 0xb80   :  { %v2569_v41 = vrot.slane %v3948_v37, %v2568_v36 }
 0xb81   :  { %v3207_v40 = vpop.f32.mrf.mxu0 }
 0xb83   :  { %v2339_v42 = vpop.f32.mrf.mxu0 }
 0xb84   :  { %2346 = vrot.lane.b32.xlu1 %v2339_v42, %s3600_s6 }
 0xb85   :  { %v3218_v43 = vpop.f32.mrf.mxu0 }
 0xb87   :  { %v2342_v44 = vpop.f32.mrf.mxu0 }
 0xb89   :  { %v3219_v45 = vpop.f32.mrf.mxu0 }
 0xb8b   :  { %v2454_v46 = vpop.f32.mrf.mxu0 }
 0xb8c   :  { %2461 = vrot.lane.b32.xlu1 %v2454_v46, %s3601_s19  ;;  %v3311_v46 = vld [vmem:[%s4238_s12 + $0x10] sm:$0xff]  }
 0xb8d   :  { %v3230_v47 = vpop.f32.mrf.mxu0 }
 0xb8e   :  { %v3312_v47 = vld [vmem:[%s4238_s12 + $0x8] sm:$0xff]  }
 0xb8f   :  { %v2457_v48 = vpop.f32.mrf.mxu0 }
 0xb90   :  { %v3313_v48 = vld [vmem:[%s4238_s12] sm:$0xff]   ;;  %s3602_s12 = smov [#allocation17]  }
 0xb91   :  { %v3231_v49 = vpop.f32.mrf.mxu0 }
 0xb92   :  { %v2871_v49 = vld [vmem:[%s4240_s14] ss:$0 sm:$0xff]  ;;  %s2799_s14 = sshll.u32 %s3602_s12, 4  ;;  %s2800_s14 = int_to_ptr.vmem [resolvable:$true] %s2799_s14 }
 0xb93   :  { %s3551_s20 = scalar_lea.vmem %s2800_s14, 256  ;;  %p3556_p13 = scmp.lt.s32.totalorder %s2800_s14, %s2800_s14 }
 0xb94   :  { %p3552_p12 = scmp.ne.s32.totalorder %s2800_s14, %s3551_s20  ;;  %p3557_p0 = scmp.lt.s32.totalorder %s3551_s20, %s3551_s20 }
 0xb96   :  { %p3558_p1 = por %p3557_p0, %p3556_p13 }
 0xb98   :  { %p3559_p2 = pnand %p3558_p1, %p3552_p12 }
 0xbab   :  { %v1776_v50 = vpop.permute.xlu0 %1775 }
 0xbac   :  { %1778 = vst.msk [vmem:[#allocation2] sm:$0xff] %vm568_vm4, %v1776_v50 }
 0xbb3   :  { %v1891_v51 = vpop.permute.xlu0 %1890 }
 0xbb4   :  { %1893 = vst.msk [vmem:[#allocation2] sm:$0xff] %vm684_vm5, %v1891_v51 }
 0xbbb   :  { %v2006_v52 = vpop.permute.xlu0 %2005 }
 0xbbc   :  { %2008 = vst.msk [vmem:[#allocation2] sm:$0xff] %vm800_vm6, %v2006_v52 }
 0xbc3   :  { %v2465_v3 = vld [vmem:[#allocation2] sm:$0xff] }
 0xbee   :  { %v2232_v53 = vpop.permute.xlu1 %2231 }
 0xbef   :  { %2234 = vst.msk [vmem:[#allocation2 + $0x8] sm:$0xff] %vm568_vm4, %v2232_v53 }
 0xbf6   :  { %v2347_v54 = vpop.permute.xlu1 %2346 }
 0xbf7   :  { %2349 = vst.msk [vmem:[#allocation2 + $0x8] sm:$0xff] %vm684_vm5, %v2347_v54 }
 0xbfe   :  { %v2462_v55 = vpop.permute.xlu1 %2461 }
 0xbff   :  { %2464 = vst.msk [vmem:[#allocation2 + $0x8] sm:$0xff] %vm800_vm6, %v2462_v55 }
 0xc06   :  { %v2466_v56 = vld [vmem:[#allocation2 + $0x8] sm:$0xff] }
 0xc07   :  { %v2467_v57 = vpack.c.bf16 %v2466_v56, %v2465_v3 }
 0xc09   :  { %3237 = vmatmul.mubr.msk.bf16.vlgmr.msra.gmra.mxu1 %vm182_vm1, %v2467_v57 }
 0xc0a   :  { %3264 = vmatprep.mubr.msk.bf16.mxu1 %vm3596_vm0, %v3595_v0  ;;  %3249 = vmatpush3.bf16.msra.mxu1 %v3306_v21 }
 0xc0b   :  { %3250 = vmatprep.subr.bf16.mxu1 %v3595_v0 }
 0xc0e   :  { %3251 = vmatpush3.bf16.msra.mxu1 %v3307_v22 }
 0xc0f   :  { %3252 = vmatprep.subr.bf16.mxu1 %v3595_v0 }
 0xc12   :  { %3253 = vmatpush3.bf16.msra.mxu1 %v3308_v18  ;;  %v2782_v18 = vsub.s32 7, %v3945_v35 }
 0xc13   :  { %3254 = vmatprep.subr.bf16.mxu1 %v3595_v0 }
 0xc16   :  { %3255 = vmatpush3.bf16.msra.mxu1 %v3309_v23  ;;  %v3390_v23 = vld [vmem:[#allocation15] sm:$0xff] }
 0xc17   :  { %3256 = vmatprep.subr.bf16.mxu1 %v3595_v0 }
 0xc1a   :  { %3257 = vmatpush3.bf16.msra.mxu1 %v3310_v24  ;;  %v2783_v24 = vrot.slane %v3390_v23, %v2782_v18 }
 0xc1b   :  { %3258 = vmatprep.subr.bf16.mxu1 %v3595_v0 }
 0xc1e   :  { %3259 = vmatpush3.bf16.msra.mxu1 %v3311_v46 }
 0xc1f   :  { %3260 = vmatprep.subr.bf16.mxu1 %v3595_v0 }
 0xc22   :  { %3261 = vmatpush3.bf16.msra.mxu1 %v3312_v47 }
 0xc23   :  { %3262 = vmatprep.subr.bf16.mxu1 %v3595_v0  ;;  %v2661_v0 = vsub.s32 6, %v3945_v35 }
 0xc25   :  { %v2662_v58 = vrot.slane %v3948_v37, %v2661_v0 }
 0xc26   :  { %3263 = vmatpush3.bf16.msra.mxu1 %v3313_v48 }
 0xcc9   :  { %v2525_v59 = vpop.f32.mrf.mxu1 }
 0xcca   :  { %v2526_v60 = vadd.f32 %v2525_v59, %v2475_v4 }
 0xccb   :  { %v3238_v61 = vpop.f32.mrf.mxu1 }
 0xccc   :  { %v2532_v62 = vadd.f32 %v2526_v60, %v3974_v19 }
 0xccd   :  { %v2528_v63 = vpop.f32.mrf.mxu1 }
 0xcce   :  { %v2529_v1 = vadd.f32 %v2528_v63, %v2475_v4  ;;  %v2534_v2 = vsel %vm182_vm1, %v2532_v62, 0.0 }
 0xccf   :  { %2535 = vadd.xlane.f32.xlu0 %v2534_v2  ;;  %v3239_v5 = vpop.f32.mrf.mxu1 }
 0xcd0   :  { %v2533_v6 = vadd.f32 %v2529_v1, %v3976_v20  ;;  %v3305_v20 = vld [vmem:[#allocation14] sm:$0xff]  }
 0xcd1   :  { %3243 = vmatpush3.bf16.msra.mxu0 %v3305_v20 }
 0xcd2   :  { %v2537_v7 = vsel %vm182_vm1, %v2533_v6, 0.0 }
 0xcd3   :  { %2538 = vadd.xlane.f32.xlu1 %v2537_v7 }
 0xd58   :  { %v2536_v8 = vpop.xlane.xlu0 %2535 }
 0xd59   :  { %v2540_v9 = vmul.f32 0.03125, %v2536_v8 }
 0xd5b   :  { %v2542_v10 = vsub.f32 %v2532_v62, %v2540_v9 }
 0xd5c   :  { %v2539_v11 = vpop.xlane.xlu1 %2538 }
 0xd5d   :  { %v2541_v12 = vmul.f32 0.03125, %v2539_v11  ;;  %v2544_v13 = vmul.f32 %v2542_v10, %v2542_v10 }
 0xd5f   :  { %v2543_v14 = vsub.f32 %v2533_v6, %v2541_v12  ;;  %v2546_v19 = vsel %vm182_vm1, %v2544_v13, 0.0 }
 0xd60   :  { %2547 = vadd.xlane.f32.xlu0 %v2546_v19 }
 0xd61   :  { %v2545_v15 = vmul.f32 %v2543_v14, %v2543_v14 }
 0xd63   :  { %v2549_v16 = vsel %vm182_vm1, %v2545_v15, 0.0 }
 0xd64   :  { %2550 = vadd.xlane.f32.xlu0 %v2549_v16 }
 0xde9   :  { %v2548_v25 = vpop.xlane.xlu0 %2547 }
 0xdea   :  { %v2552_v26 = vmul.f32 0.03125, %v2548_v25 }
 0xdec   :  { %v2554_v27 = vadd.f32 1e-05, %v2552_v26 }
 0xded   :  { %v2551_v28 = vpop.xlane.xlu0 %2550 }
 0xdee   :  { %3382 = vrsqrt.f32 %v2554_v27  ;;  %v2553_v29 = vmul.f32 0.03125, %v2551_v28  ;;  %v2883_v27 = vld [vmem:[#allocation15 + $0x8] ss:$0 sm:$0xff] }
 0xdf0   :  { %v2555_v30 = vadd.f32 1e-05, %v2553_v29 }
 0xdf2   :  { %3384 = vrsqrt.f32 %v2555_v30 }
 0xdfb   :  { %v3383_v32 = vpop.eup %3382 }
 0xdfc   :  { %v2558_v33 = vmul.f32 %v3383_v32, %v2542_v10 }
 0xdfe   :  { %v2564_v40 = vmul.f32 %v2563_v34, %v2558_v33 }
 0xdff   :  { %v3385_v38 = vpop.eup %3384 }
 0xe00   :  { %v2559_v39 = vmul.f32 %v3385_v38, %v2543_v14  ;;  %v2570_v43 = vadd.f32 %v2569_v41, %v2564_v40 }
 0xe02   :  { %v2565_v42 = vmul.f32 %v2563_v34, %v2559_v39 }
 0xe04   :  { %v2571_v44 = vadd.f32 %v2569_v41, %v2565_v42 }
 0xe06   :  { %v2572_v45 = vpack.c.bf16 %v2571_v44, %v2570_v43 }
 0xe08   :  { %3245 = vmatmul.mubr.msk.bf16.vlgmr.msra.gmra.mxu0 %vm182_vm1, %v2572_v45 }
 0xec8   :  { %v2633_v50 = vpop.f32.mrf.mxu0 }
 0xec9   :  { %v2634_v52 = vadd.f32 %v2871_v49, %v2633_v50 }
 0xeca   :  { %v3246_v51 = vpop.f32.mrf.mxu0 }
 0xecb   :  { %v2640_v3 = vmax.f32 %v2634_v52, 0.0 }
 0xecc   :  { %v2636_v53 = vpop.f32.mrf.mxu0 }
 0xecd   :  { %v2637_v54 = vadd.f32 %v2871_v49, %v2636_v53 }
 0xece   :  { %v3247_v55 = vpop.f32.mrf.mxu0 }
 0xecf   :  { %v2641_v56 = vmax.f32 %v2637_v54, 0.0 }
 0xed1   :  { %v2642_v57 = vpack.c.bf16 %v2641_v56, %v2640_v3 }
 0xed3   :  { %3265 = vmatmul.mubr.bf16.vlgmr.msra.gmra.mxu1 %v2642_v57 }
 0xf93   :  { %v2745_v4 = vpop.f32.mrf.mxu1 }
 0xf94   :  { %v2746_v59 = vadd.f32 %v2745_v4, %v2662_v58 }
 0xf95   :  { %v3266_v60 = vpop.f32.mrf.mxu1 }
 0xf96   :  { %v2752_v61 = vadd.f32 %v2746_v59, %v2570_v43 }
 0xf97   :  { %v2748_v62 = vpop.f32.mrf.mxu1 }
 0xf98   :  { %v2749_v63 = vadd.f32 %v2748_v62, %v2662_v58  ;;  %v2754_v1 = vsel %vm182_vm1, %v2752_v61, 0.0 }
 0xf99   :  { %2755 = vadd.xlane.f32.xlu1 %v2754_v1  ;;  %v3267_v2 = vpop.f32.mrf.mxu1 }
 0xf9a   :  { %v2753_v5 = vadd.f32 %v2749_v63, %v2571_v44 }
 0xf9c   :  { %v2757_v6 = vsel %vm182_vm1, %v2753_v5, 0.0 }
 0xf9d   :  { %2758 = vadd.xlane.f32.xlu0 %v2757_v6 }
0x1022   :  { %v2756_v7 = vpop.xlane.xlu1 %2755 }
0x1023   :  { %v2760_v8 = vmul.f32 0.03125, %v2756_v7 }
0x1025   :  { %v2762_v9 = vsub.f32 %v2752_v61, %v2760_v8 }
0x1026   :  { %v2759_v10 = vpop.xlane.xlu0 %2758 }
0x1027   :  { %v2761_v11 = vmul.f32 0.03125, %v2759_v10  ;;  %v2764_v37 = vmul.f32 %v2762_v9, %v2762_v9 }
0x1029   :  { %v2763_v12 = vsub.f32 %v2753_v5, %v2761_v11  ;;  %v2766_v13 = vsel %vm182_vm1, %v2764_v37, 0.0 }
0x102a   :  { %2767 = vadd.xlane.f32.xlu1 %v2766_v13 }
0x102b   :  { %v2765_v14 = vmul.f32 %v2763_v12, %v2763_v12 }
0x102d   :  { %v2769_v19 = vsel %vm182_vm1, %v2765_v14, 0.0 }
0x102e   :  { %2770 = vadd.xlane.f32.xlu0 %v2769_v19 }
0x10b3   :  { %v2768_v15 = vpop.xlane.xlu1 %2767 }
0x10b4   :  { %v2772_v16 = vmul.f32 0.03125, %v2768_v15 }
0x10b6   :  { %v2774_v17 = vadd.f32 1e-05, %v2772_v16 }
0x10b7   :  { %v2771_v20 = vpop.xlane.xlu0 %2770 }
0x10b8   :  { %3386 = vrsqrt.f32 %v2774_v17  ;;  %v2773_v21 = vmul.f32 0.03125, %v2771_v20 }
0x10ba   :  { %v2775_v22 = vadd.f32 1e-05, %v2773_v21 }
0x10bc   :  { %3388 = vrsqrt.f32 %v2775_v22 }
0x10c5   :  { %v3387_v25 = vpop.eup %3386 }
0x10c6   :  { %v2778_v26 = vmul.f32 %v3387_v25, %v2762_v9 }
0x10c8   :  { %v2784_v28 = vmul.f32 %v2783_v24, %v2778_v26 }
0x10c9   :  { %v3389_v29 = vpop.eup %3388 }
0x10ca   :  { %v2779_v30 = vmul.f32 %v3389_v29, %v2763_v12  ;;  %v2790_v31 = vadd.f32 %v2883_v27, %v2784_v28 }
0x10cc   :  { %v2785_v32 = vmul.f32 %v2783_v24, %v2779_v30  ;;  %2792 = vst.msk [vmem:[#allocation17] sm:$0xff] %vm182_vm1, %v2790_v31 }
0x10ce   :  { %v2791_v33 = vadd.f32 %v2883_v27, %v2785_v32 }
0x10d0   :  { %2793 = vst.msk [vmem:[#allocation17 + $0x8] sm:$0xff] %vm182_vm1, %v2791_v33 }
0x10d1   :  { %3562 = shalt.err (!%p3559_p2)
}
0x10d2   :  { %2805 = dma.vmem_to_hbm [thread:$0]  %s2800_s14, 256, %s4241_s15, [#allocation5], %s3593_s22, %s3593_s22, %s3594_s25  }
0x10d3   :  { %3581 = dma.done.wait [#allocation5], 256  }
0x10d4   :  { %3582 = vsyncadd [#allocation5], 4294967040 }
0x10d5   :  { %2809 = vsyncpa [#allocation4], 1 }
0x10d6   :  { %2810 = vsyncpa [#allocation7], 1 }
0x10d7   :  { %2811 = vsyncpa [#allocation10], 1 }
0x10d8   :  { %2812 = vsyncpa [#allocation13], 1 }
0x10d9   :  { %2813 = vsyncpa [#allocation16], 1 }
0x10da   :  { %2814 = vsyncpa [#allocation5], 1 }

</bundles_post_ra>
